<compile_context>
chip_gen: v6e
topology: v6e:2x2x1
jax: 0.10.0
libtpu: 0.0.40
codegen_flags: <defaults>
</compile_context>

<pallas_src>
import functools

import jax
import jax.numpy as jnp
from jax import lax
from jax.experimental import pallas as pl
from jax.experimental.pallas import tpu as pltpu

INPUT_CHANNELS = 1
NUM_CHANNELS = 32
LEAKY_SLOPE = 0.2
BN_EPS = 1e-5

LANE = 128
ROW_ALIGN = 16                       # bf16 packs 16 rows per sublane group
TARGET_BLOCK_BYTES = 2 * 1024 * 1024  # ~2 MiB of bf16 patches per input block
MAX_TILE_M = 4096
VMEM_LIMIT = 48 * 1024 * 1024        # <= 75% of v7x physical VMEM (64 MiB)
FUSED_SCRATCH_LIMIT = 16 * 1024 * 1024  # whole-layer f32 scratch cap for fused BN


def _round_up(x, m):
    return (x + m - 1) // m * m


def _pad_k(k):
    """Pad the contraction dim to a multiple of 128 only when it is cheap."""
    kp = _round_up(k, LANE)
    return kp if (kp - k) <= max(k // 8, 0) else k


def _tiling(m, k_pad):
    """Rows per tile: multiple of 16, ~TARGET_BLOCK_BYTES of bf16 patches per
    block, and at least 2 grid steps when there are enough rows (v7x dual TC)."""
    m16 = _round_up(m, ROW_ALIGN)
    cand = (TARGET_BLOCK_BYTES // (k_pad * 2)) // ROW_ALIGN * ROW_ALIGN
    cand = max(ROW_ALIGN, min(cand, MAX_TILE_M))
    if m16 >= 2 * ROW_ALIGN:
        cand = min(cand, _round_up((m16 + 1) // 2, ROW_ALIGN))
    tile_m = min(cand, m16)
    m_pad = _round_up(m16, tile_m)
    return tile_m, m_pad


def _params(sem):
    return pltpu.CompilerParams(dimension_semantics=sem,
                                vmem_limit_bytes=VMEM_LIMIT)


# ----------------------------- Pallas kernels ------------------------------

def _leaky(y):
    return jnp.maximum(y, LEAKY_SLOPE * y)


def _conv_mm_kernel(x_ref, w_ref, o_ref, *, act):
    """o = act(x @ w) for one (TILE_M, K_pad) x (K_pad, C_pad) tile."""
    y = jnp.dot(x_ref[...], w_ref[...], preferred_element_type=jnp.float32)
    if act == "leaky":
        y = _leaky(y)
    elif act == "sigmoid":
        # exp + approx reciprocal run on the EUP slot; clip covers approx error.
        y = jnp.clip(pl.reciprocal(1.0 + jnp.exp(-y), approx=True), 0.0, 1.0)
    o_ref[...] = y.astype(o_ref.dtype)


def _fused_conv_bn_kernel(x_ref, w_ref, g_ref, b_ref, o_ref,
                          y_acc, sum_ref, ssq_ref, *, m_rows):
    """Two-phase fused conv + BatchNorm(train stats) + LeakyReLU.

    grid = (2, n_tiles), both axes sequential ("arbitrary"):
      phase 0: y = x@w (f32) -> whole-layer VMEM scratch; accumulate per-channel
               sum / sum-of-squares.
      phase 1: (i==0) finalize scale/shift from the accumulated stats, then
               apply affine + LeakyReLU per tile and store bf16 to HBM.
    """
    p = pl.program_id(0)
    i = pl.program_id(1)

    @pl.when(p == 0)
    def _():
        @pl.when(i == 0)
        def _():
            sum_ref[...] = jnp.zeros_like(sum_ref)
            ssq_ref[...] = jnp.zeros_like(ssq_ref)
        y = jnp.dot(x_ref[...], w_ref[...], preferred_element_type=jnp.float32)
        y_acc[i] = y
        sum_ref[...] += jnp.sum(y, axis=0, keepdims=True)
        ssq_ref[...] += jnp.sum(y * y, axis=0, keepdims=True)

    @pl.when(p == 1)
    def _():
        @pl.when(i == 0)
        def _():
            inv_m = 1.0 / m_rows
            mean = sum_ref[...] * inv_m
            # NOTE: E[y^2]-E[y]^2 in f32; fine at these scales (see review).
            var = jnp.maximum(ssq_ref[...] * inv_m - mean * mean, 0.0)
            inv = lax.rsqrt(var + BN_EPS)
            scale = g_ref[...] * inv
            shift = b_ref[...] - mean * scale
            sum_ref[...] = scale          # reuse the stat buffers
            ssq_ref[...] = shift
        y = y_acc[i] * sum_ref[...] + ssq_ref[...]
        o_ref[...] = _leaky(y).astype(o_ref.dtype)


def _conv_mm_stats_kernel(x_ref, w_ref, o_ref, s_ref):
    """(fallback path) o = x @ w (bf16 store) + per-tile per-channel stats."""
    y = jnp.dot(x_ref[...], w_ref[...], preferred_element_type=jnp.float32)
    o_ref[...] = y.astype(o_ref.dtype)
    s_ref[0, 0, :] = jnp.sum(y, axis=0)       # direct row stores, no concat
    s_ref[0, 1, :] = jnp.sum(y * y, axis=0)


def _bn_affine_leaky_kernel(y_ref, scale_ref, shift_ref, o_ref):
    """(fallback path) o = LeakyReLU(y * scale + shift)."""
    y = y_ref[...].astype(jnp.float32) * scale_ref[...] + shift_ref[...]
    o_ref[...] = _leaky(y).astype(o_ref.dtype)


# ------------------------------ Pallas wrappers -----------------------------

def _prepare(patches, w_flat):
    """Cast to bf16 and zero-pad M (rows), K (taps) and C (channels)."""
    M, K = patches.shape
    Kw, C = w_flat.shape
    assert K == Kw
    k_pad = _pad_k(K)
    c_pad = _round_up(C, LANE)
    tile_m, m_pad = _tiling(M, k_pad)

    patches = patches.astype(jnp.bfloat16)
    w_flat = w_flat.astype(jnp.bfloat16)
    if m_pad != M or k_pad != K:
        patches = jnp.pad(patches, ((0, m_pad - M), (0, k_pad - K)))
    if k_pad != K or c_pad != C:
        w_flat = jnp.pad(w_flat, ((0, k_pad - K), (0, c_pad - C)))
    return patches, w_flat, (M, C, m_pad, c_pad, k_pad, tile_m)


def conv_act_matmul(patches, w_flat, *, act, out_dtype=jnp.bfloat16):
    """Tiled-over-M Pallas matmul with fused activation."""
    patches, w_flat, (M, C, m_pad, c_pad, k_pad, tile_m) = _prepare(patches, w_flat)
    nt = m_pad // tile_m
    y = pl.pallas_call(
        functools.partial(_conv_mm_kernel, act=act),
        grid=(nt,),
        in_specs=[pl.BlockSpec((tile_m, k_pad), lambda i: (i, 0)),
                  pl.BlockSpec((k_pad, c_pad), lambda i: (0, 0))],   # resident W
        out_specs=pl.BlockSpec((tile_m, c_pad), lambda i: (i, 0)),
        out_shape=jax.ShapeDtypeStruct((m_pad, c_pad), out_dtype),
        compiler_params=_params(("parallel",)),
    )(patches, w_flat)
    return y[:M, :C]


def conv_bn_leaky_matmul(patches, w_flat, gamma, beta):
    """conv + BatchNorm(batch stats) + LeakyReLU, fused in one pallas_call when
    the whole-layer f32 scratch fits VMEM; otherwise a two-pass bf16 path."""
    patches, w_flat, (M, C, m_pad, c_pad, k_pad, tile_m) = _prepare(patches, w_flat)
    nt = m_pad // tile_m
    gamma_p = jnp.pad(gamma.astype(jnp.float32), (0, c_pad - C),
                      constant_values=1.0).reshape(1, c_pad)
    beta_p = jnp.pad(beta.astype(jnp.float32), (0, c_pad - C)).reshape(1, c_pad)

    if m_pad * c_pad * 4 <= FUSED_SCRATCH_LIMIT:
        y = pl.pallas_call(
            functools.partial(_fused_conv_bn_kernel, m_rows=float(M)),
            grid=(2, nt),
            in_specs=[
                # phase 0 walks the tiles; phase 1 pins the last tile (no DMA).
                pl.BlockSpec((tile_m, k_pad),
                             lambda p, i: (i * (1 - p) + (nt - 1) * p, 0)),
                pl.BlockSpec((k_pad, c_pad), lambda p, i: (0, 0)),
                pl.BlockSpec((1, c_pad), lambda p, i: (0, 0)),
                pl.BlockSpec((1, c_pad), lambda p, i: (0, 0)),
            ],
            # output blocks are only produced during phase 1.
            out_specs=pl.BlockSpec((tile_m, c_pad), lambda p, i: (i * p, 0)),
            out_shape=jax.ShapeDtypeStruct((m_pad, c_pad), jnp.bfloat16),
            scratch_shapes=[pltpu.VMEM((nt, tile_m, c_pad), jnp.float32),
                            pltpu.VMEM((1, c_pad), jnp.float32),
                            pltpu.VMEM((1, c_pad), jnp.float32)],
            compiler_params=_params(("arbitrary", "arbitrary")),
        )(patches, w_flat, gamma_p, beta_p)
        return y[:M, :C]

    # ---- fallback: two-pass with a bf16 HBM intermediate (large batch) ----
    y_pad, stats = pl.pallas_call(
        _conv_mm_stats_kernel,
        grid=(nt,),
        in_specs=[pl.BlockSpec((tile_m, k_pad), lambda i: (i, 0)),
                  pl.BlockSpec((k_pad, c_pad), lambda i: (0, 0))],
        out_specs=(pl.BlockSpec((tile_m, c_pad), lambda i: (i, 0)),
                   pl.BlockSpec((1, 2, c_pad), lambda i: (i, 0, 0))),
        out_shape=(jax.ShapeDtypeStruct((m_pad, c_pad), jnp.bfloat16),
                   jax.ShapeDtypeStruct((nt, 2, c_pad), jnp.float32)),
        compiler_params=_params(("parallel",)),
    )(patches, w_flat)

    ssum = jnp.sum(stats[:, 0, :], axis=0)
    ssq = jnp.sum(stats[:, 1, :], axis=0)
    mean = ssum / M                                  # padded rows contribute 0
    var = jnp.maximum(ssq / M - mean * mean, 0.0)    # biased (PyTorch train BN)
    inv = lax.rsqrt(var + BN_EPS)
    scale = (gamma_p[0] * inv).reshape(1, c_pad)
    shift = (beta_p[0] - mean * gamma_p[0] * inv).reshape(1, c_pad)

    out = pl.pallas_call(
        _bn_affine_leaky_kernel,
        grid=(nt,),
        in_specs=[pl.BlockSpec((tile_m, c_pad), lambda i: (i, 0)),
                  pl.BlockSpec((1, c_pad), lambda i: (0, 0)),
                  pl.BlockSpec((1, c_pad), lambda i: (0, 0))],
        out_specs=pl.BlockSpec((tile_m, c_pad), lambda i: (i, 0)),
        out_shape=jax.ShapeDtypeStruct((m_pad, c_pad), jnp.bfloat16),
        compiler_params=_params(("parallel",)),
    )(y_pad, scale, shift)
    return out[:M, :C]


# ------------------------------- JAX glue ----------------------------------

def im2col(x, kh, kw, stride, pad):
    """x: (N, H, W, C) -> patches (N*OH*OW, KH*KW*C); column order (ki, kj, C)."""
    if pad:
        x = jnp.pad(x, ((0, 0), (pad, pad), (pad, pad), (0, 0)))
    N, Hp, Wp, C = x.shape
    oh = (Hp - kh) // stride + 1
    ow = (Wp - kw) // stride + 1
    cols = []
    for i in range(kh):
        for j in range(kw):
            cols.append(x[:, i:i + stride * oh:stride, j:j + stride * ow:stride, :])
    patches = jnp.stack(cols, axis=3)                  # (N, oh, ow, kh*kw, C)
    return patches.reshape(N * oh * ow, kh * kw * C), oh, ow


def conv_act(x, w, stride, pad, act, out_dtype=jnp.bfloat16):
    kh, kw, cin, cout = w.shape
    patches, oh, ow = im2col(x, kh, kw, stride, pad)
    y = conv_act_matmul(patches, w.reshape(kh * kw * cin, cout),
                        act=act, out_dtype=out_dtype)
    return y.reshape(x.shape[0], oh, ow, cout)


def conv_bn_leaky(x, w, gamma, beta, stride, pad):
    kh, kw, cin, cout = w.shape
    patches, oh, ow = im2col(x, kh, kw, stride, pad)
    y = conv_bn_leaky_matmul(patches, w.reshape(kh * kw * cin, cout), gamma, beta)
    return y.reshape(x.shape[0], oh, ow, cout)


def mnist_disc_forward(x_nchw, params):
    x = jnp.transpose(x_nchw, (0, 2, 3, 1)).astype(jnp.bfloat16)   # NCHW -> NHWC
    # conv(1->32, k4, s2, p1) + LeakyReLU                            28 -> 14
    x = conv_act(x, params["w1"], 2, 1, "leaky")
    # conv(32->64, k4, s2, p1) + BatchNorm + LeakyReLU               14 -> 7
    x = conv_bn_leaky(x, params["w2"], params["g2"], params["b2"], 2, 1)
    # conv(64->128, k3, s2, p1) + BatchNorm + LeakyReLU               7 -> 4
    x = conv_bn_leaky(x, params["w3"], params["g3"], params["b3"], 2, 1)
    # conv(128->256, k3, s2, p1) + LeakyReLU                          4 -> 2
    x = conv_act(x, params["w4"], 2, 1, "leaky")
    # conv(256->1, k2, s1, p0) + Sigmoid                              2 -> 1
    y = conv_act(x, params["w5"], 1, 0, "sigmoid", out_dtype=jnp.float32)
    return y.reshape(-1, 1)                                          # == .view(-1, 1)


def init_params(key):
    nc = NUM_CHANNELS
    shapes = {
        "w1": (4, 4, INPUT_CHANNELS, nc),
        "w2": (4, 4, nc, nc * 2),
        "w3": (3, 3, nc * 2, nc * 4),
        "w4": (3, 3, nc * 4, nc * 8),
        "w5": (2, 2, nc * 8, 1),
    }
    params = {}
    keys = jax.random.split(key, len(shapes))
    for k, (name, shp) in zip(keys, shapes.items()):
        params[name] = 0.02 * jax.random.normal(k, shp, dtype=jnp.float32)
    # BatchNorm affine params (PyTorch default init: weight=1, bias=0)
    params["g2"] = jnp.ones((nc * 2,), jnp.float32)
    params["b2"] = jnp.zeros((nc * 2,), jnp.float32)
    params["g3"] = jnp.ones((nc * 4,), jnp.float32)
    params["b3"] = jnp.zeros((nc * 4,), jnp.float32)
    return params


if __name__ == "__main__":
    key = jax.random.PRNGKey(0)
    k_param, k_in = jax.random.split(key)
    params = init_params(k_param)
    # MNIST-shaped input (28x28 required so conv5's 2x2 kernel sees a 2x2 map).
    x = jax.random.normal(k_in, (2, INPUT_CHANNELS, 28, 28), dtype=jnp.float32)

    fwd = jax.jit(mnist_disc_forward)
    out = jax.block_until_ready(fwd(x, params))
    assert out.shape == (2, 1), out.shape
    assert bool(jnp.all(jnp.isfinite(out)))
    assert bool(jnp.all((out >= 0.0) & (out <= 1.0)))
    print("KERNEL_OK")
</pallas_src>

<mosaic_0001>
module attributes {stable_mosaic.version = 11 : i64} {
  func.func @_conv_mm_kernel(%arg0: i32, %arg1: memref<208x16xbf16, #tpu.memory_space<vmem>>, %arg2: memref<16x128xbf16, #tpu.memory_space<vmem>>, %arg3: memref<208x128xbf16, #tpu.memory_space<vmem>>) attributes {dimension_semantics = [#tpu.dimension_semantics<parallel>], iteration_bounds = array<i64: 2>, scalar_prefetch = 0 : i64, scratch_operands = 0 : i64, tpu.core_type = #tpu.core_type<tc>, window_params = [{transform_indices = @transform_0, window_bounds = array<i64: 208, 16>}, {pipeline_mode = #tpu.pipeline_mode<synchronous>, transform_indices = @transform_1, window_bounds = array<i64: 16, 128>}, {transform_indices = @transform_2, window_bounds = array<i64: 208, 128>}]} {
    %c0 = arith.constant 0 : index
    %c0_0 = arith.constant 0 : index
    %0 = vector.load %arg1[%c0, %c0_0] : memref<208x16xbf16, #tpu.memory_space<vmem>>, vector<208x16xbf16>
    %c0_1 = arith.constant 0 : index
    %c0_2 = arith.constant 0 : index
    %1 = vector.load %arg2[%c0_1, %c0_2] : memref<16x128xbf16, #tpu.memory_space<vmem>>, vector<16x128xbf16>
    %cst = arith.constant dense<0.000000e+00> : vector<208x128xf32>
    %2 = tpu.matmul %0, %1, %cst {dimension_numbers = #tpu.dot_dimension_numbers<[1], [0], [0], [1], [0, 0, 1, 1], [], []>} : vector<208x16xbf16>, vector<16x128xbf16>, vector<208x128xf32> -> vector<208x128xf32>
    %cst_3 = arith.constant 2.000000e-01 : f32
    %3 = vector.broadcast %cst_3 : f32 to vector<208x128xf32>
    %4 = arith.mulf %3, %2 : vector<208x128xf32>
    %5 = arith.maximumf %2, %4 : vector<208x128xf32>
    %6 = arith.truncf %5 : vector<208x128xf32> to vector<208x128xbf16>
    %c0_4 = arith.constant 0 : index
    %c0_5 = arith.constant 0 : index
    %7 = vector.load %arg3[%c0_4, %c0_5] : memref<208x128xbf16, #tpu.memory_space<vmem>>, vector<208x128xbf16>
    tpu.vector_store %arg3[%c0_4, %c0_5], %6 {strides = array<i32>} : memref<208x128xbf16, #tpu.memory_space<vmem>>, vector<208x128xbf16>,
    return
  }
  func.func @transform_0(%arg0: i32) -> (i32, i32) {
    %c0_i32 = arith.constant 0 : i32
    %c0_i32_0 = arith.constant 0 : i32
    return %arg0, %c0_i32 : i32, i32
  }
  func.func @transform_1(%arg0: i32) -> (i32, i32) {
    %c0_i32 = arith.constant 0 : i32
    %c0_i32_0 = arith.constant 0 : i32
    %c0_i32_1 = arith.constant 0 : i32
    return %c0_i32, %c0_i32_0 : i32, i32
  }
  func.func @transform_2(%arg0: i32) -> (i32, i32) {
    %c0_i32 = arith.constant 0 : i32
    %c0_i32_0 = arith.constant 0 : i32
    return %arg0, %c0_i32 : i32, i32
  }
}

module attributes {stable_mosaic.version = 11 : i64} {
  func.func @_fused_conv_bn_kernel(%arg0: i32, %arg1: i32, %arg2: memref<64x512xbf16, #tpu.memory_space<vmem>>, %arg3: memref<512x128xbf16, #tpu.memory_space<vmem>>, %arg4: memref<1x128xf32, #tpu.memory_space<vmem>>, %arg5: memref<1x128xf32, #tpu.memory_space<vmem>>, %arg6: memref<64x128xbf16, #tpu.memory_space<vmem>>, %arg7: memref<2x64x128xf32, #tpu.memory_space<vmem>>, %arg8: memref<1x128xf32, #tpu.memory_space<vmem>>, %arg9: memref<1x128xf32, #tpu.memory_space<vmem>>) attributes {dimension_semantics = [#tpu.dimension_semantics<arbitrary>, #tpu.dimension_semantics<arbitrary>], iteration_bounds = array<i64: 2, 2>, scalar_prefetch = 0 : i64, scratch_operands = 3 : i64, tpu.core_type = #tpu.core_type<tc>, window_params = [{transform_indices = @transform_0, window_bounds = array<i64: 64, 512>}, {pipeline_mode = #tpu.pipeline_mode<synchronous>, transform_indices = @transform_1, window_bounds = array<i64: 512, 128>}, {pipeline_mode = #tpu.pipeline_mode<synchronous>, transform_indices = @transform_2, window_bounds = array<i64: 1, 128>}, {pipeline_mode = #tpu.pipeline_mode<synchronous>, transform_indices = @transform_3, window_bounds = array<i64: 1, 128>}, {transform_indices = @transform_4, window_bounds = array<i64: 64, 128>}]} {
    %c0_i32 = arith.constant 0 : i32
    %0 = arith.cmpi eq, %arg0, %c0_i32 : i32
    %1 = arith.extui %0 : i1 to i32
    %c0_i32_0 = arith.constant 0 : i32
    %2 = arith.cmpi ne, %1, %c0_i32_0 : i32
    scf.if %2 {
      %c0_i32_2 = arith.constant 0 : i32
      %6 = arith.cmpi eq, %arg1, %c0_i32_2 : i32
      %7 = arith.extui %6 : i1 to i32
      %c0_i32_3 = arith.constant 0 : i32
      %8 = arith.cmpi ne, %7, %c0_i32_3 : i32
      scf.if %8 {
        %cst_19 = arith.constant 0.000000e+00 : f32
        %27 = vector.broadcast %cst_19 : f32 to vector<1x128xf32>
        %c0_20 = arith.constant 0 : index
        %c0_21 = arith.constant 0 : index
        %28 = vector.load %arg8[%c0_20, %c0_21] : memref<1x128xf32, #tpu.memory_space<vmem>>, vector<1x128xf32>
        tpu.vector_store %arg8[%c0_20, %c0_21], %27 {strides = array<i32>} : memref<1x128xf32, #tpu.memory_space<vmem>>, vector<1x128xf32>,
        %cst_22 = arith.constant 0.000000e+00 : f32
        %29 = vector.broadcast %cst_22 : f32 to vector<1x128xf32>
        %c0_23 = arith.constant 0 : index
        %c0_24 = arith.constant 0 : index
        %30 = vector.load %arg9[%c0_23, %c0_24] : memref<1x128xf32, #tpu.memory_space<vmem>>, vector<1x128xf32>
        tpu.vector_store %arg9[%c0_23, %c0_24], %29 {strides = array<i32>} : memref<1x128xf32, #tpu.memory_space<vmem>>, vector<1x128xf32>,
      } else {
      }
      %c0 = arith.constant 0 : index
      %c0_4 = arith.constant 0 : index
      %9 = vector.load %arg2[%c0, %c0_4] : memref<64x512xbf16, #tpu.memory_space<vmem>>, vector<64x512xbf16>
      %c0_5 = arith.constant 0 : index
      %c0_6 = arith.constant 0 : index
      %10 = vector.load %arg3[%c0_5, %c0_6] : memref<512x128xbf16, #tpu.memory_space<vmem>>, vector<512x128xbf16>
      %cst = arith.constant dense<0.000000e+00> : vector<64x128xf32>
      %11 = tpu.matmul %9, %10, %cst {dimension_numbers = #tpu.dot_dimension_numbers<[1], [0], [0], [1], [0, 0, 1, 1], [], []>} : vector<64x512xbf16>, vector<512x128xbf16>, vector<64x128xf32> -> vector<64x128xf32>
      %12 = arith.index_cast %arg1 : i32 to index
      %c0_7 = arith.constant 0 : index
      %c0_8 = arith.constant 0 : index
      %13 = vector.load %arg7[%12, %c0_7, %c0_8] : memref<2x64x128xf32, #tpu.memory_space<vmem>>, vector<1x64x128xf32>
      %14 = vector.shape_cast %13 : vector<1x64x128xf32> to vector<64x128xf32>
      %15 = vector.shape_cast %11 : vector<64x128xf32> to vector<1x64x128xf32>
      tpu.vector_store %arg7[%12, %c0_7, %c0_8], %15 {strides = array<i32>} : memref<2x64x128xf32, #tpu.memory_space<vmem>>, vector<1x64x128xf32>,
      %c0_9 = arith.constant 0 : index
      %c0_10 = arith.constant 0 : index
      %16 = vector.load %arg8[%c0_9, %c0_10] : memref<1x128xf32, #tpu.memory_space<vmem>>, vector<1x128xf32>
      %cst_11 = arith.constant dense<0.000000e+00> : vector<128xf32>
      %17 = vector.multi_reduction <add>, %11, %cst_11 [0] : vector<64x128xf32> to vector<128xf32>
      %18 = vector.shape_cast %17 : vector<128xf32> to vector<1x128xf32>
      %19 = arith.addf %16, %18 : vector<1x128xf32>
      %c0_12 = arith.constant 0 : index
      %c0_13 = arith.constant 0 : index
      %20 = vector.load %arg8[%c0_12, %c0_13] : memref<1x128xf32, #tpu.memory_space<vmem>>, vector<1x128xf32>
      tpu.vector_store %arg8[%c0_12, %c0_13], %19 {strides = array<i32>} : memref<1x128xf32, #tpu.memory_space<vmem>>, vector<1x128xf32>,
      %c0_14 = arith.constant 0 : index
      %c0_15 = arith.constant 0 : index
      %21 = vector.load %arg9[%c0_14, %c0_15] : memref<1x128xf32, #tpu.memory_space<vmem>>, vector<1x128xf32>
      %22 = arith.mulf %11, %11 : vector<64x128xf32>
      %cst_16 = arith.constant dense<0.000000e+00> : vector<128xf32>
      %23 = vector.multi_reduction <add>, %22, %cst_16 [0] : vector<64x128xf32> to vector<128xf32>
      %24 = vector.shape_cast %23 : vector<128xf32> to vector<1x128xf32>
      %25 = arith.addf %21, %24 : vector<1x128xf32>
      %c0_17 = arith.constant 0 : index
      %c0_18 = arith.constant 0 : index
      %26 = vector.load %arg9[%c0_17, %c0_18] : memref<1x128xf32, #tpu.memory_space<vmem>>, vector<1x128xf32>
      tpu.vector_store %arg9[%c0_17, %c0_18], %25 {strides = array<i32>} : memref<1x128xf32, #tpu.memory_space<vmem>>, vector<1x128xf32>,
    } else {
    }
    %c1_i32 = arith.constant 1 : i32
    %3 = arith.cmpi eq, %arg0, %c1_i32 : i32
    %4 = arith.extui %3 : i1 to i32
    %c0_i32_1 = arith.constant 0 : i32
    %5 = arith.cmpi ne, %4, %c0_i32_1 : i32
    scf.if %5 {
      %c0_i32_2 = arith.constant 0 : i32
      %6 = arith.cmpi eq, %arg1, %c0_i32_2 : i32
      %7 = arith.extui %6 : i1 to i32
      %c0_i32_3 = arith.constant 0 : i32
      %8 = arith.cmpi ne, %7, %c0_i32_3 : i32
      scf.if %8 {
        %c0_11 = arith.constant 0 : index
        %c0_12 = arith.constant 0 : index
        %23 = vector.load %arg8[%c0_11, %c0_12] : memref<1x128xf32, #tpu.memory_space<vmem>>, vector<1x128xf32>
        %cst_13 = arith.constant 0.0102040814 : f32
        %24 = vector.broadcast %cst_13 : f32 to vector<1x128xf32>
        %25 = arith.mulf %23, %24 : vector<1x128xf32>
        %c0_14 = arith.constant 0 : index
        %c0_15 = arith.constant 0 : index
        %26 = vector.load %arg9[%c0_14, %c0_15] : memref<1x128xf32, #tpu.memory_space<vmem>>, vector<1x128xf32>
        %cst_16 = arith.constant 0.0102040814 : f32
        %27 = vector.broadcast %cst_16 : f32 to vector<1x128xf32>
        %28 = arith.mulf %26, %27 : vector<1x128xf32>
        %29 = arith.mulf %25, %25 : vector<1x128xf32>
        %30 = arith.subf %28, %29 : vector<1x128xf32>
        %cst_17 = arith.constant 0.000000e+00 : f32
        %31 = vector.broadcast %cst_17 : f32 to vector<1x128xf32>
        %32 = arith.maximumf %30, %31 : vector<1x128xf32>
        %cst_18 = arith.constant 9.99999974E-6 : f32
        %33 = vector.broadcast %cst_18 : f32 to vector<1x128xf32>
        %34 = arith.addf %32, %33 : vector<1x128xf32>
        %35 = math.rsqrt %34 : vector<1x128xf32>
        %c0_19 = arith.constant 0 : index
        %c0_20 = arith.constant 0 : index
        %36 = vector.load %arg4[%c0_19, %c0_20] : memref<1x128xf32, #tpu.memory_space<vmem>>, vector<1x128xf32>
        %37 = arith.mulf %36, %35 : vector<1x128xf32>
        %c0_21 = arith.constant 0 : index
        %c0_22 = arith.constant 0 : index
        %38 = vector.load %arg5[%c0_21, %c0_22] : memref<1x128xf32, #tpu.memory_space<vmem>>, vector<1x128xf32>
        %39 = arith.mulf %25, %37 : vector<1x128xf32>
        %40 = arith.subf %38, %39 : vector<1x128xf32>
        %c0_23 = arith.constant 0 : index
        %c0_24 = arith.constant 0 : index
        %41 = vector.load %arg8[%c0_23, %c0_24] : memref<1x128xf32, #tpu.memory_space<vmem>>, vector<1x128xf32>
        tpu.vector_store %arg8[%c0_23, %c0_24], %37 {strides = array<i32>} : memref<1x128xf32, #tpu.memory_space<vmem>>, vector<1x128xf32>,
        %c0_25 = arith.constant 0 : index
        %c0_26 = arith.constant 0 : index
        %42 = vector.load %arg9[%c0_25, %c0_26] : memref<1x128xf32, #tpu.memory_space<vmem>>, vector<1x128xf32>
        tpu.vector_store %arg9[%c0_25, %c0_26], %40 {strides = array<i32>} : memref<1x128xf32, #tpu.memory_space<vmem>>, vector<1x128xf32>,
      } else {
      }
      %9 = arith.index_cast %arg1 : i32 to index
      %c0 = arith.constant 0 : index
      %c0_4 = arith.constant 0 : index
      %10 = vector.load %arg7[%9, %c0, %c0_4] : memref<2x64x128xf32, #tpu.memory_space<vmem>>, vector<1x64x128xf32>
      %11 = vector.shape_cast %10 : vector<1x64x128xf32> to vector<64x128xf32>
      %c0_5 = arith.constant 0 : index
      %c0_6 = arith.constant 0 : index
      %12 = vector.load %arg8[%c0_5, %c0_6] : memref<1x128xf32, #tpu.memory_space<vmem>>, vector<1x128xf32>
      %13 = vector.broadcast %12 : vector<1x128xf32> to vector<64x128xf32>
      %14 = arith.mulf %11, %13 : vector<64x128xf32>
      %c0_7 = arith.constant 0 : index
      %c0_8 = arith.constant 0 : index
      %15 = vector.load %arg9[%c0_7, %c0_8] : memref<1x128xf32, #tpu.memory_space<vmem>>, vector<1x128xf32>
      %16 = vector.broadcast %15 : vector<1x128xf32> to vector<64x128xf32>
      %17 = arith.addf %14, %16 : vector<64x128xf32>
      %cst = arith.constant 2.000000e-01 : f32
      %18 = vector.broadcast %cst : f32 to vector<64x128xf32>
      %19 = arith.mulf %18, %17 : vector<64x128xf32>
      %20 = arith.maximumf %17, %19 : vector<64x128xf32>
      %21 = arith.truncf %20 : vector<64x128xf32> to vector<64x128xbf16>
      %c0_9 = arith.constant 0 : index
      %c0_10 = arith.constant 0 : index
      %22 = vector.load %arg6[%c0_9, %c0_10] : memref<64x128xbf16, #tpu.memory_space<vmem>>, vector<64x128xbf16>
      tpu.vector_store %arg6[%c0_9, %c0_10], %21 {strides = array<i32>} : memref<64x128xbf16, #tpu.memory_space<vmem>>, vector<64x128xbf16>,
    } else {
    }
    return
  }
  func.func @transform_0(%arg0: i32, %arg1: i32) -> (i32, i32) {
    %c1_i32 = arith.constant 1 : i32
    %0 = arith.subi %c1_i32, %arg0 : i32
    %1 = arith.muli %arg1, %0 : i32
    %c1_i32_0 = arith.constant 1 : i32
    %2 = arith.muli %c1_i32_0, %arg0 : i32
    %3 = arith.addi %1, %2 : i32
    %c0_i32 = arith.constant 0 : i32
    %c0_i32_1 = arith.constant 0 : i32
    return %3, %c0_i32 : i32, i32
  }
  func.func @transform_1(%arg0: i32, %arg1: i32) -> (i32, i32) {
    %c0_i32 = arith.constant 0 : i32
    %c0_i32_0 = arith.constant 0 : i32
    %c0_i32_1 = arith.constant 0 : i32
    return %c0_i32, %c0_i32_0 : i32, i32
  }
  func.func @transform_2(%arg0: i32, %arg1: i32) -> (i32, i32) {
    %c0_i32 = arith.constant 0 : i32
    %c0_i32_0 = arith.constant 0 : i32
    %c0_i32_1 = arith.constant 0 : i32
    return %c0_i32, %c0_i32_0 : i32, i32
  }
  func.func @transform_3(%arg0: i32, %arg1: i32) -> (i32, i32) {
    %c0_i32 = arith.constant 0 : i32
    %c0_i32_0 = arith.constant 0 : i32
    %c0_i32_1 = arith.constant 0 : i32
    return %c0_i32, %c0_i32_0 : i32, i32
  }
  func.func @transform_4(%arg0: i32, %arg1: i32) -> (i32, i32) {
    %0 = arith.muli %arg1, %arg0 : i32
    %c0_i32 = arith.constant 0 : i32
    %c0_i32_0 = arith.constant 0 : i32
    return %0, %c0_i32 : i32, i32
  }
}

module attributes {stable_mosaic.version = 11 : i64} {
  func.func @_fused_conv_bn_kernel(%arg0: i32, %arg1: i32, %arg2: memref<16x640xbf16, #tpu.memory_space<vmem>>, %arg3: memref<640x128xbf16, #tpu.memory_space<vmem>>, %arg4: memref<1x128xf32, #tpu.memory_space<vmem>>, %arg5: memref<1x128xf32, #tpu.memory_space<vmem>>, %arg6: memref<16x128xbf16, #tpu.memory_space<vmem>>, %arg7: memref<2x16x128xf32, #tpu.memory_space<vmem>>, %arg8: memref<1x128xf32, #tpu.memory_space<vmem>>, %arg9: memref<1x128xf32, #tpu.memory_space<vmem>>) attributes {dimension_semantics = [#tpu.dimension_semantics<arbitrary>, #tpu.dimension_semantics<arbitrary>], iteration_bounds = array<i64: 2, 2>, scalar_prefetch = 0 : i64, scratch_operands = 3 : i64, tpu.core_type = #tpu.core_type<tc>, window_params = [{transform_indices = @transform_0, window_bounds = array<i64: 16, 640>}, {pipeline_mode = #tpu.pipeline_mode<synchronous>, transform_indices = @transform_1, window_bounds = array<i64: 640, 128>}, {pipeline_mode = #tpu.pipeline_mode<synchronous>, transform_indices = @transform_2, window_bounds = array<i64: 1, 128>}, {pipeline_mode = #tpu.pipeline_mode<synchronous>, transform_indices = @transform_3, window_bounds = array<i64: 1, 128>}, {transform_indices = @transform_4, window_bounds = array<i64: 16, 128>}]} {
    %c0_i32 = arith.constant 0 : i32
    %0 = arith.cmpi eq, %arg0, %c0_i32 : i32
    %1 = arith.extui %0 : i1 to i32
    %c0_i32_0 = arith.constant 0 : i32
    %2 = arith.cmpi ne, %1, %c0_i32_0 : i32
    scf.if %2 {
      %c0_i32_2 = arith.constant 0 : i32
      %6 = arith.cmpi eq, %arg1, %c0_i32_2 : i32
      %7 = arith.extui %6 : i1 to i32
      %c0_i32_3 = arith.constant 0 : i32
      %8 = arith.cmpi ne, %7, %c0_i32_3 : i32
      scf.if %8 {
        %cst_19 = arith.constant 0.000000e+00 : f32
        %27 = vector.broadcast %cst_19 : f32 to vector<1x128xf32>
        %c0_20 = arith.constant 0 : index
        %c0_21 = arith.constant 0 : index
        %28 = vector.load %arg8[%c0_20, %c0_21] : memref<1x128xf32, #tpu.memory_space<vmem>>, vector<1x128xf32>
        tpu.vector_store %arg8[%c0_20, %c0_21], %27 {strides = array<i32>} : memref<1x128xf32, #tpu.memory_space<vmem>>, vector<1x128xf32>,
        %cst_22 = arith.constant 0.000000e+00 : f32
        %29 = vector.broadcast %cst_22 : f32 to vector<1x128xf32>
        %c0_23 = arith.constant 0 : index
        %c0_24 = arith.constant 0 : index
        %30 = vector.load %arg9[%c0_23, %c0_24] : memref<1x128xf32, #tpu.memory_space<vmem>>, vector<1x128xf32>
        tpu.vector_store %arg9[%c0_23, %c0_24], %29 {strides = array<i32>} : memref<1x128xf32, #tpu.memory_space<vmem>>, vector<1x128xf32>,
      } else {
      }
      %c0 = arith.constant 0 : index
      %c0_4 = arith.constant 0 : index
      %9 = vector.load %arg2[%c0, %c0_4] : memref<16x640xbf16, #tpu.memory_space<vmem>>, vector<16x640xbf16>
      %c0_5 = arith.constant 0 : index
      %c0_6 = arith.constant 0 : index
      %10 = vector.load %arg3[%c0_5, %c0_6] : memref<640x128xbf16, #tpu.memory_space<vmem>>, vector<640x128xbf16>
      %cst = arith.constant dense<0.000000e+00> : vector<16x128xf32>
      %11 = tpu.matmul %9, %10, %cst {dimension_numbers = #tpu.dot_dimension_numbers<[1], [0], [0], [1], [0, 0, 1, 1], [], []>} : vector<16x640xbf16>, vector<640x128xbf16>, vector<16x128xf32> -> vector<16x128xf32>
      %12 = arith.index_cast %arg1 : i32 to index
      %c0_7 = arith.constant 0 : index
      %c0_8 = arith.constant 0 : index
      %13 = vector.load %arg7[%12, %c0_7, %c0_8] : memref<2x16x128xf32, #tpu.memory_space<vmem>>, vector<1x16x128xf32>
      %14 = vector.shape_cast %13 : vector<1x16x128xf32> to vector<16x128xf32>
      %15 = vector.shape_cast %11 : vector<16x128xf32> to vector<1x16x128xf32>
      tpu.vector_store %arg7[%12, %c0_7, %c0_8], %15 {strides = array<i32>} : memref<2x16x128xf32, #tpu.memory_space<vmem>>, vector<1x16x128xf32>,
      %c0_9 = arith.constant 0 : index
      %c0_10 = arith.constant 0 : index
      %16 = vector.load %arg8[%c0_9, %c0_10] : memref<1x128xf32, #tpu.memory_space<vmem>>, vector<1x128xf32>
      %cst_11 = arith.constant dense<0.000000e+00> : vector<128xf32>
      %17 = vector.multi_reduction <add>, %11, %cst_11 [0] : vector<16x128xf32> to vector<128xf32>
      %18 = vector.shape_cast %17 : vector<128xf32> to vector<1x128xf32>
      %19 = arith.addf %16, %18 : vector<1x128xf32>
      %c0_12 = arith.constant 0 : index
      %c0_13 = arith.constant 0 : index
      %20 = vector.load %arg8[%c0_12, %c0_13] : memref<1x128xf32, #tpu.memory_space<vmem>>, vector<1x128xf32>
      tpu.vector_store %arg8[%c0_12, %c0_13], %19 {strides = array<i32>} : memref<1x128xf32, #tpu.memory_space<vmem>>, vector<1x128xf32>,
      %c0_14 = arith.constant 0 : index
      %c0_15 = arith.constant 0 : index
      %21 = vector.load %arg9[%c0_14, %c0_15] : memref<1x128xf32, #tpu.memory_space<vmem>>, vector<1x128xf32>
      %22 = arith.mulf %11, %11 : vector<16x128xf32>
      %cst_16 = arith.constant dense<0.000000e+00> : vector<128xf32>
      %23 = vector.multi_reduction <add>, %22, %cst_16 [0] : vector<16x128xf32> to vector<128xf32>
      %24 = vector.shape_cast %23 : vector<128xf32> to vector<1x128xf32>
      %25 = arith.addf %21, %24 : vector<1x128xf32>
      %c0_17 = arith.constant 0 : index
      %c0_18 = arith.constant 0 : index
      %26 = vector.load %arg9[%c0_17, %c0_18] : memref<1x128xf32, #tpu.memory_space<vmem>>, vector<1x128xf32>
      tpu.vector_store %arg9[%c0_17, %c0_18], %25 {strides = array<i32>} : memref<1x128xf32, #tpu.memory_space<vmem>>, vector<1x128xf32>,
    } else {
    }
    %c1_i32 = arith.constant 1 : i32
    %3 = arith.cmpi eq, %arg0, %c1_i32 : i32
    %4 = arith.extui %3 : i1 to i32
    %c0_i32_1 = arith.constant 0 : i32
    %5 = arith.cmpi ne, %4, %c0_i32_1 : i32
    scf.if %5 {
      %c0_i32_2 = arith.constant 0 : i32
      %6 = arith.cmpi eq, %arg1, %c0_i32_2 : i32
      %7 = arith.extui %6 : i1 to i32
      %c0_i32_3 = arith.constant 0 : i32
      %8 = arith.cmpi ne, %7, %c0_i32_3 : i32
      scf.if %8 {
        %c0_11 = arith.constant 0 : index
        %c0_12 = arith.constant 0 : index
        %23 = vector.load %arg8[%c0_11, %c0_12] : memref<1x128xf32, #tpu.memory_space<vmem>>, vector<1x128xf32>
        %cst_13 = arith.constant 3.125000e-02 : f32
        %24 = vector.broadcast %cst_13 : f32 to vector<1x128xf32>
        %25 = arith.mulf %23, %24 : vector<1x128xf32>
        %c0_14 = arith.constant 0 : index
        %c0_15 = arith.constant 0 : index
        %26 = vector.load %arg9[%c0_14, %c0_15] : memref<1x128xf32, #tpu.memory_space<vmem>>, vector<1x128xf32>
        %cst_16 = arith.constant 3.125000e-02 : f32
        %27 = vector.broadcast %cst_16 : f32 to vector<1x128xf32>
        %28 = arith.mulf %26, %27 : vector<1x128xf32>
        %29 = arith.mulf %25, %25 : vector<1x128xf32>
        %30 = arith.subf %28, %29 : vector<1x128xf32>
        %cst_17 = arith.constant 0.000000e+00 : f32
        %31 = vector.broadcast %cst_17 : f32 to vector<1x128xf32>
        %32 = arith.maximumf %30, %31 : vector<1x128xf32>
        %cst_18 = arith.constant 9.99999974E-6 : f32
        %33 = vector.broadcast %cst_18 : f32 to vector<1x128xf32>
        %34 = arith.addf %32, %33 : vector<1x128xf32>
        %35 = math.rsqrt %34 : vector<1x128xf32>
        %c0_19 = arith.constant 0 : index
        %c0_20 = arith.constant 0 : index
        %36 = vector.load %arg4[%c0_19, %c0_20] : memref<1x128xf32, #tpu.memory_space<vmem>>, vector<1x128xf32>
        %37 = arith.mulf %36, %35 : vector<1x128xf32>
        %c0_21 = arith.constant 0 : index
        %c0_22 = arith.constant 0 : index
        %38 = vector.load %arg5[%c0_21, %c0_22] : memref<1x128xf32, #tpu.memory_space<vmem>>, vector<1x128xf32>
        %39 = arith.mulf %25, %37 : vector<1x128xf32>
        %40 = arith.subf %38, %39 : vector<1x128xf32>
        %c0_23 = arith.constant 0 : index
        %c0_24 = arith.constant 0 : index
        %41 = vector.load %arg8[%c0_23, %c0_24] : memref<1x128xf32, #tpu.memory_space<vmem>>, vector<1x128xf32>
        tpu.vector_store %arg8[%c0_23, %c0_24], %37 {strides = array<i32>} : memref<1x128xf32, #tpu.memory_space<vmem>>, vector<1x128xf32>,
        %c0_25 = arith.constant 0 : index
        %c0_26 = arith.constant 0 : index
        %42 = vector.load %arg9[%c0_25, %c0_26] : memref<1x128xf32, #tpu.memory_space<vmem>>, vector<1x128xf32>
        tpu.vector_store %arg9[%c0_25, %c0_26], %40 {strides = array<i32>} : memref<1x128xf32, #tpu.memory_space<vmem>>, vector<1x128xf32>,
      } else {
      }
      %9 = arith.index_cast %arg1 : i32 to index
      %c0 = arith.constant 0 : index
      %c0_4 = arith.constant 0 : index
      %10 = vector.load %arg7[%9, %c0, %c0_4] : memref<2x16x128xf32, #tpu.memory_space<vmem>>, vector<1x16x128xf32>
      %11 = vector.shape_cast %10 : vector<1x16x128xf32> to vector<16x128xf32>
      %c0_5 = arith.constant 0 : index
      %c0_6 = arith.constant 0 : index
      %12 = vector.load %arg8[%c0_5, %c0_6] : memref<1x128xf32, #tpu.memory_space<vmem>>, vector<1x128xf32>
      %13 = vector.broadcast %12 : vector<1x128xf32> to vector<16x128xf32>
      %14 = arith.mulf %11, %13 : vector<16x128xf32>
      %c0_7 = arith.constant 0 : index
      %c0_8 = arith.constant 0 : index
      %15 = vector.load %arg9[%c0_7, %c0_8] : memref<1x128xf32, #tpu.memory_space<vmem>>, vector<1x128xf32>
      %16 = vector.broadcast %15 : vector<1x128xf32> to vector<16x128xf32>
      %17 = arith.addf %14, %16 : vector<16x128xf32>
      %cst = arith.constant 2.000000e-01 : f32
      %18 = vector.broadcast %cst : f32 to vector<16x128xf32>
      %19 = arith.mulf %18, %17 : vector<16x128xf32>
      %20 = arith.maximumf %17, %19 : vector<16x128xf32>
      %21 = arith.truncf %20 : vector<16x128xf32> to vector<16x128xbf16>
      %c0_9 = arith.constant 0 : index
      %c0_10 = arith.constant 0 : index
      %22 = vector.load %arg6[%c0_9, %c0_10] : memref<16x128xbf16, #tpu.memory_space<vmem>>, vector<16x128xbf16>
      tpu.vector_store %arg6[%c0_9, %c0_10], %21 {strides = array<i32>} : memref<16x128xbf16, #tpu.memory_space<vmem>>, vector<16x128xbf16>,
    } else {
    }
    return
  }
  func.func @transform_0(%arg0: i32, %arg1: i32) -> (i32, i32) {
    %c1_i32 = arith.constant 1 : i32
    %0 = arith.subi %c1_i32, %arg0 : i32
    %1 = arith.muli %arg1, %0 : i32
    %c1_i32_0 = arith.constant 1 : i32
    %2 = arith.muli %c1_i32_0, %arg0 : i32
    %3 = arith.addi %1, %2 : i32
    %c0_i32 = arith.constant 0 : i32
    %c0_i32_1 = arith.constant 0 : i32
    return %3, %c0_i32 : i32, i32
  }
  func.func @transform_1(%arg0: i32, %arg1: i32) -> (i32, i32) {
    %c0_i32 = arith.constant 0 : i32
    %c0_i32_0 = arith.constant 0 : i32
    %c0_i32_1 = arith.constant 0 : i32
    return %c0_i32, %c0_i32_0 : i32, i32
  }
  func.func @transform_2(%arg0: i32, %arg1: i32) -> (i32, i32) {
    %c0_i32 = arith.constant 0 : i32
    %c0_i32_0 = arith.constant 0 : i32
    %c0_i32_1 = arith.constant 0 : i32
    return %c0_i32, %c0_i32_0 : i32, i32
  }
  func.func @transform_3(%arg0: i32, %arg1: i32) -> (i32, i32) {
    %c0_i32 = arith.constant 0 : i32
    %c0_i32_0 = arith.constant 0 : i32
    %c0_i32_1 = arith.constant 0 : i32
    return %c0_i32, %c0_i32_0 : i32, i32
  }
  func.func @transform_4(%arg0: i32, %arg1: i32) -> (i32, i32) {
    %0 = arith.muli %arg1, %arg0 : i32
    %c0_i32 = arith.constant 0 : i32
    %c0_i32_0 = arith.constant 0 : i32
    return %0, %c0_i32 : i32, i32
  }
}

module attributes {stable_mosaic.version = 11 : i64} {
  func.func @_conv_mm_kernel(%arg0: i32, %arg1: memref<16x1152xbf16, #tpu.memory_space<vmem>>, %arg2: memref<1152x256xbf16, #tpu.memory_space<vmem>>, %arg3: memref<16x256xbf16, #tpu.memory_space<vmem>>) attributes {dimension_semantics = [#tpu.dimension_semantics<parallel>], iteration_bounds = array<i64: 1>, scalar_prefetch = 0 : i64, scratch_operands = 0 : i64, tpu.core_type = #tpu.core_type<tc>, window_params = [{transform_indices = @transform_0, window_bounds = array<i64: 16, 1152>}, {pipeline_mode = #tpu.pipeline_mode<synchronous>, transform_indices = @transform_1, window_bounds = array<i64: 1152, 256>}, {transform_indices = @transform_2, window_bounds = array<i64: 16, 256>}]} {
    %c0 = arith.constant 0 : index
    %c0_0 = arith.constant 0 : index
    %0 = vector.load %arg1[%c0, %c0_0] : memref<16x1152xbf16, #tpu.memory_space<vmem>>, vector<16x1152xbf16>
    %c0_1 = arith.constant 0 : index
    %c0_2 = arith.constant 0 : index
    %1 = vector.load %arg2[%c0_1, %c0_2] : memref<1152x256xbf16, #tpu.memory_space<vmem>>, vector<1152x256xbf16>
    %cst = arith.constant dense<0.000000e+00> : vector<16x256xf32>
    %2 = tpu.matmul %0, %1, %cst {dimension_numbers = #tpu.dot_dimension_numbers<[1], [0], [0], [1], [0, 0, 1, 1], [], []>} : vector<16x1152xbf16>, vector<1152x256xbf16>, vector<16x256xf32> -> vector<16x256xf32>
    %cst_3 = arith.constant 2.000000e-01 : f32
    %3 = vector.broadcast %cst_3 : f32 to vector<16x256xf32>
    %4 = arith.mulf %3, %2 : vector<16x256xf32>
    %5 = arith.maximumf %2, %4 : vector<16x256xf32>
    %6 = arith.truncf %5 : vector<16x256xf32> to vector<16x256xbf16>
    %c0_4 = arith.constant 0 : index
    %c0_5 = arith.constant 0 : index
    %7 = vector.load %arg3[%c0_4, %c0_5] : memref<16x256xbf16, #tpu.memory_space<vmem>>, vector<16x256xbf16>
    tpu.vector_store %arg3[%c0_4, %c0_5], %6 {strides = array<i32>} : memref<16x256xbf16, #tpu.memory_space<vmem>>, vector<16x256xbf16>,
    return
  }
  func.func @transform_0(%arg0: i32) -> (i32, i32) {
    %c0_i32 = arith.constant 0 : i32
    %c0_i32_0 = arith.constant 0 : i32
    return %arg0, %c0_i32 : i32, i32
  }
  func.func @transform_1(%arg0: i32) -> (i32, i32) {
    %c0_i32 = arith.constant 0 : i32
    %c0_i32_0 = arith.constant 0 : i32
    %c0_i32_1 = arith.constant 0 : i32
    return %c0_i32, %c0_i32_0 : i32, i32
  }
  func.func @transform_2(%arg0: i32) -> (i32, i32) {
    %c0_i32 = arith.constant 0 : i32
    %c0_i32_0 = arith.constant 0 : i32
    return %arg0, %c0_i32 : i32, i32
  }
}

module attributes {stable_mosaic.version = 11 : i64} {
  func.func @_conv_mm_kernel(%arg0: i32, %arg1: memref<16x1024xbf16, #tpu.memory_space<vmem>>, %arg2: memref<1024x128xbf16, #tpu.memory_space<vmem>>, %arg3: memref<16x128xf32, #tpu.memory_space<vmem>>) attributes {dimension_semantics = [#tpu.dimension_semantics<parallel>], iteration_bounds = array<i64: 1>, scalar_prefetch = 0 : i64, scratch_operands = 0 : i64, tpu.core_type = #tpu.core_type<tc>, window_params = [{transform_indices = @transform_0, window_bounds = array<i64: 16, 1024>}, {pipeline_mode = #tpu.pipeline_mode<synchronous>, transform_indices = @transform_1, window_bounds = array<i64: 1024, 128>}, {transform_indices = @transform_2, window_bounds = array<i64: 16, 128>}]} {
    %c0 = arith.constant 0 : index
    %c0_0 = arith.constant 0 : index
    %0 = vector.load %arg1[%c0, %c0_0] : memref<16x1024xbf16, #tpu.memory_space<vmem>>, vector<16x1024xbf16>
    %c0_1 = arith.constant 0 : index
    %c0_2 = arith.constant 0 : index
    %1 = vector.load %arg2[%c0_1, %c0_2] : memref<1024x128xbf16, #tpu.memory_space<vmem>>, vector<1024x128xbf16>
    %cst = arith.constant dense<0.000000e+00> : vector<16x128xf32>
    %2 = tpu.matmul %0, %1, %cst {dimension_numbers = #tpu.dot_dimension_numbers<[1], [0], [0], [1], [0, 0, 1, 1], [], []>} : vector<16x1024xbf16>, vector<1024x128xbf16>, vector<16x128xf32> -> vector<16x128xf32>
    %cst_3 = arith.constant 0.000000e+00 : f32
    %3 = vector.broadcast %cst_3 : f32 to vector<16x128xf32>
    %4 = arith.subf %3, %2 : vector<16x128xf32>
    %5 = math.exp %4 : vector<16x128xf32>
    %cst_4 = arith.constant 1.000000e+00 : f32
    %6 = vector.broadcast %cst_4 : f32 to vector<16x128xf32>
    %7 = arith.addf %6, %5 : vector<16x128xf32>
    %8 = tpu.reciprocal %7 {approx = true} : vector<16x128xf32> -> vector<16x128xf32>
    %cst_5 = arith.constant 0.000000e+00 : f32
    %cst_6 = arith.constant 1.000000e+00 : f32
    %9 = vector.broadcast %cst_5 : f32 to vector<16x128xf32>
    %10 = arith.maximumf %9, %8 : vector<16x128xf32>
    %11 = vector.broadcast %cst_6 : f32 to vector<16x128xf32>
    %12 = arith.minimumf %11, %10 : vector<16x128xf32>
    %c0_7 = arith.constant 0 : index
    %c0_8 = arith.constant 0 : index
    %13 = vector.load %arg3[%c0_7, %c0_8] : memref<16x128xf32, #tpu.memory_space<vmem>>, vector<16x128xf32>
    tpu.vector_store %arg3[%c0_7, %c0_8], %12 {strides = array<i32>} : memref<16x128xf32, #tpu.memory_space<vmem>>, vector<16x128xf32>,
    return
  }
  func.func @transform_0(%arg0: i32) -> (i32, i32) {
    %c0_i32 = arith.constant 0 : i32
    %c0_i32_0 = arith.constant 0 : i32
    return %arg0, %c0_i32 : i32, i32
  }
  func.func @transform_1(%arg0: i32) -> (i32, i32) {
    %c0_i32 = arith.constant 0 : i32
    %c0_i32_0 = arith.constant 0 : i32
    %c0_i32_1 = arith.constant 0 : i32
    return %c0_i32, %c0_i32_0 : i32, i32
  }
  func.func @transform_2(%arg0: i32) -> (i32, i32) {
    %c0_i32 = arith.constant 0 : i32
    %c0_i32_0 = arith.constant 0 : i32
    return %arg0, %c0_i32 : i32, i32
  }
}

</mosaic_0001>

<bundles_post_ra>
// kernel: mnist_disc_forward.5
= control target key start
LH: loop header
LB: loop body
LE: loop exit
PB: predicated region body
PF: predicated region fallthrough
CT: control target
= control target key end

     0   :  { %s946_s9 = smov 0   ;;  %s1029_s0 = inlined_call_operand.vmem [shape: bf16[416,16], index: 0, kind: input, shape index: {}]   ;;  %s1030_s1 = inlined_call_operand.vmem [shape: bf16[16,128], index: 1, kind: input, shape index: {}]   ;;  %s1031_s2 = inlined_call_operand.vmem [shape: bf16[416,128], index: 2, kind: output, shape index: {}]  }
   0x1 LB: > { %s662_s10 = sadd.s32 4294967295, %s927_s9   ;;  %p666_p0 = scmp.ge.s32.totalorder %s927_s9, 1  ;;  %s927_s9 = sphi %s946_s9, %s12_s9  }
   0x2   : > { %p113_p1 = scmp.lt.s32.totalorder %s927_s9, 3 }
   0x4   : > { %p114_p2 = pnand %p666_p0, %p113_p1 }
   0x5   : > { %s135_s13 = smul.u32 (!%p114_p2), 26, %s662_s10 }
   0x6   : > { %117 = sbr.rel (%p114_p2) target bundleno = 268 (0x10c), region = 28 }
   0x7   : > { %p136_p3 = scmp.lt.s32.totalorder (!%p114_p2), %s135_s13, 51 }
   0xb   : > { %v907_v0 = vld [vmem:[%s1030_s1] sm:$0xff]   ;;  %v929_v1 = vmov 0.0   ;;  %vm930_vm0 = vmmov 0   ;;  %s1033_s13 = smov (!%p136_p3, %s135_s13), 51  ;;  %vm247_vm1 = vcmask 130048  }
   0xc   : > { %841 = vmatprep.subr.bf16.mxu0 %v929_v1  ;;  %895 = vmatprep.subr.bf16.mxu1 %v929_v1  ;;  %s667_s14 = sshll.u32 %s1033_s13, 2 }
   0xd   : > { %842 = vmatpush3.bf16.msra.mxu0 %v907_v0  ;;  %896 = vmatpush3.bf16.msra.mxu1 %v907_v0  ;;  %s967_s17 = scalar_lea.vmem %s1029_s0, %s667_s14  ;;  %s1011_s20 = scalar_lea.vmem %s1031_s2, %s667_s14 }
   0xe   : > { %843 = vmatprep.mubr.msk.bf16.mxu0 %vm930_vm0, %v929_v1  ;;  %871 = vmatprep.mubr.msk.bf16.mxu1 %vm930_vm0, %v929_v1  ;;  %v908_v2 = vld [vmem:[%s967_s17] sm:$0xff]   ;;  %v909_v3 = vld [vmem:[%s967_s17 + $0x38] sm:$0xff]   ;;  %v910_v4 = vld [vmem:[%s967_s17 + $0x8] sm:$0xff]  }
   0xf   : > { %v911_v5 = vld [vmem:[%s967_s17 + $0x40] sm:$0xff]   ;;  %v912_v6 = vld [vmem:[%s967_s17 + $0x10] sm:$0xff]   ;;  %v913_v7 = vld [vmem:[%s967_s17 + $0x48] sm:$0xff]  }
  0x10   : > { %844 = vmatmul.mubr.msk.bf16.vlgmr.msra.gmra.mxu0 %vm247_vm1, %v908_v2  ;;  %872 = vmatmul.mubr.msk.bf16.vlgmr.msra.gmra.mxu1 %vm247_vm1, %v909_v3  ;;  %v914_v8 = vld [vmem:[%s967_s17 + $0x18] sm:$0xff]   ;;  %v915_v9 = vld [vmem:[%s967_s17 + $0x50] sm:$0xff]   ;;  %v916_v10 = vld [vmem:[%s967_s17 + $0x20] sm:$0xff]  }
  0x11   : > { %847 = vmatprep.mubr.msk.bf16.mxu0 %vm930_vm0, %v929_v1  ;;  %875 = vmatprep.mubr.msk.bf16.mxu1 %vm930_vm0, %v929_v1  ;;  %v917_v11 = vld [vmem:[%s967_s17 + $0x58] sm:$0xff]   ;;  %v918_v12 = vld [vmem:[%s967_s17 + $0x28] sm:$0xff]   ;;  %v919_v13 = vld [vmem:[%s967_s17 + $0x60] sm:$0xff]  }
  0x12   : > { %v920_v14 = vld [vmem:[%s967_s17 + $0x30] sm:$0xff]  }
  0x18   : > { %848 = vmatmul.mubr.msk.bf16.gmra.mxu0 %vm247_vm1, %v910_v4  ;;  %876 = vmatmul.mubr.msk.bf16.gmra.mxu1 %vm247_vm1, %v911_v5 }
  0x19   : > { %851 = vmatprep.mubr.msk.bf16.mxu0 %vm930_vm0, %v929_v1  ;;  %879 = vmatprep.mubr.msk.bf16.mxu1 %vm930_vm0, %v929_v1 }
  0x20   : > { %852 = vmatmul.mubr.msk.bf16.gmra.mxu0 %vm247_vm1, %v912_v6  ;;  %880 = vmatmul.mubr.msk.bf16.gmra.mxu1 %vm247_vm1, %v913_v7 }
  0x21   : > { %855 = vmatprep.mubr.msk.bf16.mxu0 %vm930_vm0, %v929_v1  ;;  %883 = vmatprep.mubr.msk.bf16.mxu1 %vm930_vm0, %v929_v1 }
  0x28   : > { %856 = vmatmul.mubr.msk.bf16.gmra.mxu0 %vm247_vm1, %v914_v8  ;;  %884 = vmatmul.mubr.msk.bf16.gmra.mxu1 %vm247_vm1, %v915_v9 }
  0x29   : > { %859 = vmatprep.mubr.msk.bf16.mxu0 %vm930_vm0, %v929_v1  ;;  %887 = vmatprep.mubr.msk.bf16.mxu1 %vm930_vm0, %v929_v1 }
  0x30   : > { %860 = vmatmul.mubr.msk.bf16.gmra.mxu0 %vm247_vm1, %v916_v10  ;;  %888 = vmatmul.mubr.msk.bf16.gmra.mxu1 %vm247_vm1, %v917_v11 }
  0x31   : > { %863 = vmatprep.mubr.msk.bf16.mxu0 %vm930_vm0, %v929_v1  ;;  %891 = vmatprep.mubr.msk.bf16.mxu1 %vm930_vm0, %v929_v1 }
  0x38   : > { %864 = vmatmul.mubr.msk.bf16.gmra.mxu0 %vm247_vm1, %v918_v12  ;;  %892 = vmatmul.mubr.msk.bf16.gmra.mxu1 %vm247_vm1, %v919_v13 }
  0x39   : > { %867 = vmatprep.mubr.msk.bf16.mxu0 %vm930_vm0, %v929_v1 }
  0x40   : > { %868 = vmatmul.mubr.msk.bf16.gmra.mxu0 %vm247_vm1, %v920_v14 }
  0xd0   : > { %v321_v15 = vpop.f32.mrf.mxu0  ;;  %v377_v16 = vpop.f32.mrf.mxu1 }
  0xd1   : > { %v438_v18 = vmul.f32 0.2, %v377_v16  ;;  %v424_v19 = vmul.f32 0.2, %v321_v15 }
  0xd2   : > { %v845_v17 = vpop.f32.mrf.mxu0  ;;  %v873_v20 = vpop.f32.mrf.mxu1 }
  0xd3   : > { %v464_v24 = vmax.f32 %v377_v16, %v438_v18  ;;  %v450_v27 = vmax.f32 %v321_v15, %v424_v19 }
  0xd4   : > { %v324_v21 = vpop.f32.mrf.mxu0  ;;  %v380_v23 = vpop.f32.mrf.mxu1 }
  0xd5   : > { %v425_v22 = vmul.f32 0.2, %v324_v21  ;;  %v439_v26 = vmul.f32 0.2, %v380_v23 }
  0xd6   : > { %v846_v25 = vpop.f32.mrf.mxu0  ;;  %v874_v29 = vpop.f32.mrf.mxu1 }
  0xd7   : > { %v451_v28 = vmax.f32 %v324_v21, %v425_v22  ;;  %v465_v30 = vmax.f32 %v380_v23, %v439_v26 }
  0xd8   : > { %v329_v31 = vpop.f32.mrf.mxu0  ;;  %v385_v33 = vpop.f32.mrf.mxu1 }
  0xd9   : > { %v753_v32 = vpack.c.bf16 %v451_v28, %v450_v27  ;;  %v788_v34 = vpack.c.bf16 %v465_v30, %v464_v24  ;;  %v440_v36 = vmul.f32 0.2, %v385_v33  ;;  %v426_v37 = vmul.f32 0.2, %v329_v31 }
  0xda   : > { %v849_v35 = vpop.f32.mrf.mxu0  ;;  %v877_v38 = vpop.f32.mrf.mxu1 }
  0xdb   : > { %754 = vst [vmem:[%s1011_s20] sm:$0xff] %v753_v32   ;;  %821 = vst [vmem:[%s1011_s20 + $0x38] sm:$0xff] %v788_v34   ;;  %v466_v42 = vmax.f32 %v385_v33, %v440_v36  ;;  %v452_v45 = vmax.f32 %v329_v31, %v426_v37 }
  0xdc   : > { %v332_v39 = vpop.f32.mrf.mxu0  ;;  %v388_v41 = vpop.f32.mrf.mxu1 }
  0xdd   : > { %v427_v40 = vmul.f32 0.2, %v332_v39  ;;  %v441_v44 = vmul.f32 0.2, %v388_v41 }
  0xde   : > { %v850_v43 = vpop.f32.mrf.mxu0  ;;  %v878_v47 = vpop.f32.mrf.mxu1 }
  0xdf   : > { %v453_v46 = vmax.f32 %v332_v39, %v427_v40  ;;  %v467_v48 = vmax.f32 %v388_v41, %v441_v44 }
  0xe0   : > { %v337_v49 = vpop.f32.mrf.mxu0  ;;  %v393_v51 = vpop.f32.mrf.mxu1 }
  0xe1   : > { %v758_v50 = vpack.c.bf16 %v453_v46, %v452_v45  ;;  %v793_v52 = vpack.c.bf16 %v467_v48, %v466_v42  ;;  %v442_v54 = vmul.f32 0.2, %v393_v51  ;;  %v428_v55 = vmul.f32 0.2, %v337_v49 }
  0xe2   : > { %v853_v53 = vpop.f32.mrf.mxu0  ;;  %v881_v56 = vpop.f32.mrf.mxu1 }
  0xe3   : > { %815 = vst [vmem:[%s1011_s20 + $0x8] sm:$0xff] %v758_v50   ;;  %822 = vst [vmem:[%s1011_s20 + $0x40] sm:$0xff] %v793_v52   ;;  %v468_v60 = vmax.f32 %v393_v51, %v442_v54  ;;  %v454_v63 = vmax.f32 %v337_v49, %v428_v55 }
  0xe4   : > { %v340_v57 = vpop.f32.mrf.mxu0  ;;  %v396_v59 = vpop.f32.mrf.mxu1 }
  0xe5   : > { %v429_v58 = vmul.f32 0.2, %v340_v57  ;;  %v443_v62 = vmul.f32 0.2, %v396_v59 }
  0xe6   : > { %v854_v61 = vpop.f32.mrf.mxu0  ;;  %v882_v1 = vpop.f32.mrf.mxu1 }
  0xe7   : > { %v455_v0 = vmax.f32 %v340_v57, %v429_v58  ;;  %v469_v2 = vmax.f32 %v396_v59, %v443_v62 }
  0xe8   : > { %v345_v3 = vpop.f32.mrf.mxu0  ;;  %v401_v5 = vpop.f32.mrf.mxu1 }
  0xe9   : > { %v763_v4 = vpack.c.bf16 %v455_v0, %v454_v63  ;;  %v798_v6 = vpack.c.bf16 %v469_v2, %v468_v60  ;;  %v444_v8 = vmul.f32 0.2, %v401_v5  ;;  %v430_v9 = vmul.f32 0.2, %v345_v3 }
  0xea   : > { %v857_v7 = vpop.f32.mrf.mxu0  ;;  %v885_v10 = vpop.f32.mrf.mxu1 }
  0xeb   : > { %816 = vst [vmem:[%s1011_s20 + $0x10] sm:$0xff] %v763_v4   ;;  %823 = vst [vmem:[%s1011_s20 + $0x48] sm:$0xff] %v798_v6   ;;  %v470_v14 = vmax.f32 %v401_v5, %v444_v8  ;;  %v456_v17 = vmax.f32 %v345_v3, %v430_v9 }
  0xec   : > { %v348_v11 = vpop.f32.mrf.mxu0  ;;  %v404_v13 = vpop.f32.mrf.mxu1 }
  0xed   : > { %v431_v12 = vmul.f32 0.2, %v348_v11  ;;  %v445_v16 = vmul.f32 0.2, %v404_v13 }
  0xee   : > { %v858_v15 = vpop.f32.mrf.mxu0  ;;  %v886_v19 = vpop.f32.mrf.mxu1 }
  0xef   : > { %v457_v18 = vmax.f32 %v348_v11, %v431_v12  ;;  %v471_v20 = vmax.f32 %v404_v13, %v445_v16 }
  0xf0   : > { %v353_v21 = vpop.f32.mrf.mxu0  ;;  %v409_v23 = vpop.f32.mrf.mxu1 }
  0xf1   : > { %v768_v22 = vpack.c.bf16 %v457_v18, %v456_v17  ;;  %v803_v24 = vpack.c.bf16 %v471_v20, %v470_v14  ;;  %v446_v26 = vmul.f32 0.2, %v409_v23  ;;  %v432_v27 = vmul.f32 0.2, %v353_v21 }
  0xf2   : > { %v861_v25 = vpop.f32.mrf.mxu0  ;;  %v889_v28 = vpop.f32.mrf.mxu1 }
  0xf3   : > { %817 = vst [vmem:[%s1011_s20 + $0x18] sm:$0xff] %v768_v22   ;;  %824 = vst [vmem:[%s1011_s20 + $0x50] sm:$0xff] %v803_v24   ;;  %v472_v32 = vmax.f32 %v409_v23, %v446_v26  ;;  %v458_v35 = vmax.f32 %v353_v21, %v432_v27 }
  0xf4   : > { %v356_v29 = vpop.f32.mrf.mxu0  ;;  %v412_v31 = vpop.f32.mrf.mxu1 }
  0xf5   : > { %v433_v30 = vmul.f32 0.2, %v356_v29  ;;  %v447_v34 = vmul.f32 0.2, %v412_v31 }
  0xf6   : > { %v862_v33 = vpop.f32.mrf.mxu0  ;;  %v890_v37 = vpop.f32.mrf.mxu1 }
  0xf7   : > { %v459_v36 = vmax.f32 %v356_v29, %v433_v30  ;;  %v473_v38 = vmax.f32 %v412_v31, %v447_v34 }
  0xf8   : > { %v361_v39 = vpop.f32.mrf.mxu0  ;;  %v417_v41 = vpop.f32.mrf.mxu1 }
  0xf9   : > { %v773_v40 = vpack.c.bf16 %v459_v36, %v458_v35  ;;  %v808_v42 = vpack.c.bf16 %v473_v38, %v472_v32  ;;  %v448_v44 = vmul.f32 0.2, %v417_v41  ;;  %v434_v45 = vmul.f32 0.2, %v361_v39 }
  0xfa   : > { %v865_v43 = vpop.f32.mrf.mxu0  ;;  %v893_v46 = vpop.f32.mrf.mxu1 }
  0xfb   : > { %818 = vst [vmem:[%s1011_s20 + $0x20] sm:$0xff] %v773_v40   ;;  %825 = vst [vmem:[%s1011_s20 + $0x58] sm:$0xff] %v808_v42   ;;  %v474_v50 = vmax.f32 %v417_v41, %v448_v44  ;;  %v460_v53 = vmax.f32 %v361_v39, %v434_v45 }
  0xfc   : > { %v364_v47 = vpop.f32.mrf.mxu0  ;;  %v420_v49 = vpop.f32.mrf.mxu1 }
  0xfd   : > { %v435_v48 = vmul.f32 0.2, %v364_v47  ;;  %v449_v52 = vmul.f32 0.2, %v420_v49 }
  0xfe   : > { %v866_v51 = vpop.f32.mrf.mxu0  ;;  %v894_v55 = vpop.f32.mrf.mxu1 }
  0xff   : > { %v461_v54 = vmax.f32 %v364_v47, %v435_v48  ;;  %v475_v56 = vmax.f32 %v420_v49, %v449_v52 }
 0x100   : > { %v369_v57 = vpop.f32.mrf.mxu0 }
 0x101   : > { %v778_v58 = vpack.c.bf16 %v461_v54, %v460_v53  ;;  %v813_v59 = vpack.c.bf16 %v475_v56, %v474_v50  ;;  %v436_v61 = vmul.f32 0.2, %v369_v57 }
 0x102   : > { %v869_v60 = vpop.f32.mrf.mxu0 }
 0x103   : > { %819 = vst [vmem:[%s1011_s20 + $0x28] sm:$0xff] %v778_v58   ;;  %826 = vst [vmem:[%s1011_s20 + $0x60] sm:$0xff] %v813_v59   ;;  %v462_v1 = vmax.f32 %v369_v57, %v436_v61 }
 0x104   : > { %v372_v62 = vpop.f32.mrf.mxu0 }
 0x105   : > { %v437_v63 = vmul.f32 0.2, %v372_v62 }
 0x106   : > { %v870_v0 = vpop.f32.mrf.mxu0 }
 0x107   : > { %v463_v2 = vmax.f32 %v372_v62, %v437_v63 }
 0x109   : > { %v783_v3 = vpack.c.bf16 %v463_v2, %v462_v1 }
 0x10b   : > { %820 = vst [vmem:[%s1011_s20 + $0x30] sm:$0xff] %v783_v3  }
 0x10c PF: > { %s12_s9 = sadd.s32 1, %s927_s9  }
 0x10d   : > { %p9_p4 = scmp.ge.s32.totalorder %s12_s9, 4  }
 0x10f   :  { %11 = sbr.rel (!%p9_p4) target bundleno = 1 (0x1), region = 58 }

// kernel: mnist_disc_forward.6
= control target key start
LH: loop header
LB: loop body
LE: loop exit
PB: predicated region body
PF: predicated region fallthrough
CT: control target
= control target key end

     0   :  { %s1333_s15 = smov 0   ;;  %s1335_s16 = smov 0   ;;  %s1535_s0 = inlined_call_operand.vmem [shape: bf16[128,512], index: 0, kind: input, shape index: {}]   ;;  %s1536_s1 = inlined_call_operand.vmem [shape: bf16[512,128], index: 1, kind: input, shape index: {}]   ;;  %s1537_s2 = inlined_call_operand.vmem [shape: f32[1,128], index: 2, kind: input, shape index: {}]   ;;  %s1538_s3 = inlined_call_operand.vmem [shape: f32[1,128], index: 3, kind: input, shape index: {}]   ;;  %s1539_s4 = inlined_call_operand.vmem [shape: bf16[128,128], index: 4, kind: output, shape index: {}]  }
   0x1   :  { %s1337_s17 = smov 0   ;;  %s1339_s18 = smov 0  }
   0x2   :  { %s1341_s19 = smov 0  }
   0x3 LB: > { %s23_s20 = sadd.s32 1, %s1297_s17  ;;  %s26_s21 = sadd.s32 1, %s1301_s18  ;;  %s1305_s19 = sphi %s1341_s19, %s14_s19   ;;  %s1301_s18 = sphi %s1339_s18, %s1543_s18   ;;  %s1297_s17 = sphi %s1337_s17, %s1542_s17   ;;  %s1293_s16 = sphi %s1335_s16, %s1541_s16   ;;  %s1289_s15 = sphi %s1333_s15, %s1540_s15  }
   0x4   : > { %p24_p0 = scmp.ge.s32.totalorder %s23_s20, 2  ;;  %p984_p1 = scmp.ge.s32.totalorder %s1305_s19, 1 }
   0x5   : > { %p190_p2 = scmp.lt.s32.totalorder %s1305_s19, 5 }
   0x6   : > { %s1545_s20 = smov (%p24_p0, %s23_s20), 0  ;;  %s1547_s21 = smov (!%p24_p0, %s26_s21), %s1301_s18 }
   0x7   : > { %p191_p3 = pnand %p984_p1, %p190_p2  ;;  %p28_p4 = scmp.ge.s32.totalorder %s1547_s21, 2 }
   0x8   : > { %s221_s22 = ssub.s32 (!%p191_p3), 1, %s1293_s16  ;;  %s234_s23 = smul.u32 (!%p191_p3), %s1289_s15, %s1293_s16 }
   0x9   : > { %s1549_s21 = smov (%p28_p4, %s1547_s21), 0  ;;  %194 = sbr.rel (%p191_p3) target bundleno = 371 (0x173), region = 36 }
   0xa   : > { %s222_s24 = smul.u32 (!%p191_p3), %s1289_s15, %s221_s22  ;;  %s988_s25 = sshll.u32 (!%p191_p3), %s234_s23, 3 }
   0xb   : > { %p236_p5 = scmp.lt.s32.totalorder (!%p191_p3), %s988_s25, 15  ;;  %p990_p7 = scmp.ne.s32.totalorder (!%p191_p3), %s1293_s16, 0 }
   0xc   : > { %s223_s26 = sadd.s32 (!%p191_p3), %s1293_s16, %s222_s24 }
   0xd   : > { %s985_s27 = sshll.u32 (!%p191_p3), %s223_s26, 3 }
   0xe   : > { %p225_p6 = scmp.lt.s32.totalorder %s985_s27, 15  ;;  %s1551_s25 = smov (!%p236_p5, %s988_s25), 15 }
   0xf   : > { %s989_s28 = sshll.u32 %s1551_s25, 2  ;;  %246 = sbr.rel (%p990_p7) target bundleno = 308 (0x134), region = 40 }
  0x10   : > { %s1553_s27 = smov (!%p225_p6, %s985_s27), 15  ;;  %s1375_s6 = scalar_lea.vmem %s1539_s4, %s989_s28 }
  0x11   : > { %s1056_s29 = sshll.u32 %s1553_s27, 4  ;;  %p991_p8 = scmp.ne.s32.totalorder (!%p990_p7), %s1289_s15, 0 }
  0x12   : > { %s1380_s9 = scalar_lea.vmem %s1535_s0, %s1056_s29 }
  0x14   : > { %250 = sbr.rel (%p991_p8) target bundleno = 27 (0x1b), region = 44 }
  0x19   : > { %v1307_v0 = vmov 0.0  }
  0x1a   : > { %251 = vst [vmem:[#allocation3] sm:$0x1] %v1307_v0  ;;  %252 = vst [vmem:[#allocation4] sm:$0x1] %v1307_v0 }
  0x1b PF: > { %v1209_v1 = vld [vmem:[%s1536_s1 + $0x78] sm:$0xff]   ;;  %v1213_v5 = vld [vmem:[%s1536_s1 + $0x70] sm:$0xff]   ;;  %v1217_v9 = vld [vmem:[%s1536_s1 + $0x68] sm:$0xff]   ;;  %s1040_s30 = sshll.u32 %s1289_s15, 6 }
  0x1c   : > { %v1210_v2 = vld [vmem:[%s1536_s1 + $0xf8] sm:$0xff]   ;;  %1088 = vmatprep.subr.bf16.mxu0 %v1209_v1  ;;  %v1214_v6 = vld [vmem:[%s1536_s1 + $0xf0] sm:$0xff]   ;;  %v1218_v10 = vld [vmem:[%s1536_s1 + $0xe8] sm:$0xff]   ;;  %s1497_s5 = scalar_lea.vmem [#allocation2], %s1040_s30 }
  0x1d   : > { %v1211_v3 = vld [vmem:[%s1536_s1 + $0x38] sm:$0xff]   ;;  %1128 = vmatprep.subr.bf16.mxu1 %v1210_v2  ;;  %v1215_v7 = vld [vmem:[%s1536_s1 + $0x30] sm:$0xff]   ;;  %v1219_v11 = vld [vmem:[%s1536_s1 + $0x28] sm:$0xff]  }
  0x1e   : > { %v1212_v4 = vld [vmem:[%s1536_s1 + $0xb8] sm:$0xff]   ;;  %1089 = vmatpush3.bf16.msra.mxu0 %v1211_v3  ;;  %v1216_v8 = vld [vmem:[%s1536_s1 + $0xb0] sm:$0xff]   ;;  %v1220_v12 = vld [vmem:[%s1536_s1 + $0xa8] sm:$0xff]  }
  0x1f   : > { %1129 = vmatpush3.bf16.msra.mxu1 %v1212_v4  ;;  %1090 = vmatprep.subr.bf16.mxu0 %v1213_v5  ;;  %v1221_v13 = vld [vmem:[%s1536_s1 + $0x60] sm:$0xff]   ;;  %v1225_v17 = vld [vmem:[%s1536_s1 + $0x58] sm:$0xff]   ;;  %v1229_v21 = vld [vmem:[%s1536_s1 + $0x50] sm:$0xff]  }
  0x20   : > { %1130 = vmatprep.subr.bf16.mxu1 %v1214_v6  ;;  %v1222_v14 = vld [vmem:[%s1536_s1 + $0xe0] sm:$0xff]   ;;  %v1226_v18 = vld [vmem:[%s1536_s1 + $0xd8] sm:$0xff]   ;;  %v1230_v22 = vld [vmem:[%s1536_s1 + $0xd0] sm:$0xff]  }
  0x21   : > { %v1223_v15 = vld [vmem:[%s1536_s1 + $0x20] sm:$0xff]   ;;  %v1227_v19 = vld [vmem:[%s1536_s1 + $0x18] sm:$0xff]   ;;  %v1231_v23 = vld [vmem:[%s1536_s1 + $0x10] sm:$0xff]  }
  0x22   : > { %1091 = vmatpush3.bf16.msra.mxu0 %v1215_v7  ;;  %v1224_v16 = vld [vmem:[%s1536_s1 + $0xa0] sm:$0xff]   ;;  %v1228_v20 = vld [vmem:[%s1536_s1 + $0x98] sm:$0xff]   ;;  %v1232_v24 = vld [vmem:[%s1536_s1 + $0x90] sm:$0xff]  }
  0x23   : > { %1131 = vmatpush3.bf16.msra.mxu1 %v1216_v8  ;;  %1092 = vmatprep.subr.bf16.mxu0 %v1217_v9  ;;  %v1233_v25 = vld [vmem:[%s1536_s1 + $0x48] sm:$0xff]   ;;  %v1237_v29 = vld [vmem:[%s1536_s1 + $0x40] sm:$0xff]  }
  0x24   : > { %1132 = vmatprep.subr.bf16.mxu1 %v1218_v10  ;;  %v1234_v26 = vld [vmem:[%s1536_s1 + $0xc8] sm:$0xff]   ;;  %v1238_v30 = vld [vmem:[%s1536_s1 + $0xc0] sm:$0xff]  }
  0x25   : > { %v1235_v27 = vld [vmem:[%s1536_s1 + $0x8] sm:$0xff]   ;;  %v1239_v31 = vld [vmem:[%s1536_s1] sm:$0xff]  }
  0x26   : > { %1093 = vmatpush3.bf16.msra.mxu0 %v1219_v11  ;;  %v1236_v28 = vld [vmem:[%s1536_s1 + $0x88] sm:$0xff]   ;;  %v1240_v32 = vld [vmem:[%s1536_s1 + $0x80] sm:$0xff]  }
  0x27   : > { %1133 = vmatpush3.bf16.msra.mxu1 %v1220_v12  ;;  %1094 = vmatprep.subr.bf16.mxu0 %v1221_v13  ;;  %v1241_v33 = vld [vmem:[%s1380_s9] ss:$16 sps:$4 sm:$0xff]   ;;  %v1243_v34 = vld [vmem:[%s1380_s9 + $0x4] ss:$16 sps:$4 sm:$0xff]   ;;  %v1244_v35 = vld [vmem:[%s1380_s9 + $0x8] ss:$16 sps:$4 sm:$0xff]  }
  0x28   : > { %1134 = vmatprep.subr.bf16.mxu1 %v1222_v14  ;;  %v1246_v36 = vld [vmem:[%s1380_s9 + $0xc] ss:$16 sps:$4 sm:$0xff]   ;;  %637 = vmatprep.mubr.bf16.mxu0 %v1243_v34  ;;  %v1247_v37 = vld [vmem:[%s1380_s9 + $0x24] ss:$16 sps:$4 sm:$0xff]   ;;  %v1251_v39 = vld [vmem:[%s1380_s9 + $0x20] ss:$16 sps:$4 sm:$0xff]  }
  0x29   : > { %702 = vmatprep.mubr.bf16.mxu1 %v1246_v36  ;;  %v1249_v38 = vld [vmem:[%s1380_s9 + $0x2c] ss:$16 sps:$4 sm:$0xff]   ;;  %v1252_v40 = vld [vmem:[%s1380_s9 + $0x28] ss:$16 sps:$4 sm:$0xff]   ;;  %v1253_v41 = vld [vmem:[%s1380_s9 + $0x44] ss:$16 sps:$4 sm:$0xff]  }
  0x2a   : > { %1095 = vmatpush3.bf16.msra.mxu0 %v1223_v15  ;;  %v1255_v42 = vld [vmem:[%s1380_s9 + $0x4c] ss:$16 sps:$4 sm:$0xff]   ;;  %v1257_v43 = vld [vmem:[%s1380_s9 + $0x40] ss:$16 sps:$4 sm:$0xff]   ;;  %v1258_v44 = vld [vmem:[%s1380_s9 + $0x48] ss:$16 sps:$4 sm:$0xff]  }
  0x2b   : > { %1135 = vmatpush3.bf16.msra.mxu1 %v1224_v16  ;;  %1096 = vmatprep.subr.bf16.mxu0 %v1225_v17  ;;  %v1259_v45 = vld [vmem:[%s1380_s9 + $0x64] ss:$16 sps:$4 sm:$0xff]   ;;  %v1261_v46 = vld [vmem:[%s1380_s9 + $0x6c] ss:$16 sps:$4 sm:$0xff]   ;;  %v1263_v47 = vld [vmem:[%s1380_s9 + $0x60] ss:$16 sps:$4 sm:$0xff]  }
  0x2c   : > { %1136 = vmatprep.subr.bf16.mxu1 %v1226_v18  ;;  %v1264_v48 = vld [vmem:[%s1380_s9 + $0x68] ss:$16 sps:$4 sm:$0xff]  }
  0x2e   : > { %1097 = vmatpush3.bf16.msra.mxu0 %v1227_v19 }
  0x2f   : > { %1137 = vmatpush3.bf16.msra.mxu1 %v1228_v20  ;;  %1098 = vmatprep.subr.bf16.mxu0 %v1229_v21 }
  0x30   : > { %1138 = vmatprep.subr.bf16.mxu1 %v1230_v22 }
  0x32   : > { %1099 = vmatpush3.bf16.msra.mxu0 %v1231_v23 }
  0x33   : > { %1139 = vmatpush3.bf16.msra.mxu1 %v1232_v24  ;;  %1100 = vmatprep.subr.bf16.mxu0 %v1233_v25 }
  0x34   : > { %1140 = vmatprep.subr.bf16.mxu1 %v1234_v26 }
  0x36   : > { %1101 = vmatpush3.bf16.msra.mxu0 %v1235_v27 }
  0x37   : > { %1141 = vmatpush3.bf16.msra.mxu1 %v1236_v28  ;;  %1102 = vmatprep.subr.bf16.mxu0 %v1237_v29 }
  0x38   : > { %1142 = vmatprep.subr.bf16.mxu1 %v1238_v30 }
  0x3a   : > { %1103 = vmatpush3.bf16.msra.mxu0 %v1239_v31 }
  0x3b   : > { %1143 = vmatpush3.bf16.msra.mxu1 %v1240_v32 }
  0x3d   : > { %638 = vmatmul.mubr.bf16.vlgmr.msra.gmra.mxu0 %v1241_v33 }
  0x3e   : > { %703 = vmatmul.mubr.bf16.vlgmr.msra.gmra.mxu1 %v1244_v35  ;;  %645 = vmatprep.mubr.bf16.mxu0 %v1247_v37 }
  0x3f   : > { %710 = vmatprep.mubr.bf16.mxu1 %v1249_v38 }
  0x45   : > { %646 = vmatmul.mubr.bf16.gmra.mxu0 %v1251_v39 }
  0x46   : > { %711 = vmatmul.mubr.bf16.gmra.mxu1 %v1252_v40  ;;  %653 = vmatprep.mubr.bf16.mxu0 %v1253_v41 }
  0x47   : > { %718 = vmatprep.mubr.bf16.mxu1 %v1255_v42 }
  0x4d   : > { %654 = vmatmul.mubr.bf16.gmra.mxu0 %v1257_v43 }
  0x4e   : > { %719 = vmatmul.mubr.bf16.gmra.mxu1 %v1258_v44  ;;  %661 = vmatprep.mubr.bf16.mxu0 %v1259_v45 }
  0x4f   : > { %726 = vmatprep.mubr.bf16.mxu1 %v1261_v46 }
  0x55   : > { %662 = vmatmul.mubr.bf16.gmra.mxu0 %v1263_v47 }
  0x56   : > { %727 = vmatmul.mubr.bf16.gmra.mxu1 %v1264_v48 }
  0xfd   : > { %v1104_v49 = vpop.f32.mrf.mxu0 }
  0xfe   : > { %v1144_v50 = vpop.f32.mrf.mxu1 }
  0xff   : > { %v1105_v51 = vpop.f32.mrf.mxu0 }
 0x100   : > { %v1106_v52 = vadd.f32 %v1105_v51, %v1104_v49  ;;  %v1145_v53 = vpop.f32.mrf.mxu1 }
 0x101   : > { %v1146_v54 = vadd.f32 %v1145_v53, %v1144_v50  ;;  %v1107_v55 = vpop.f32.mrf.mxu0 }
 0x102   : > { %v1147_v56 = vpop.f32.mrf.mxu1 }
 0x103   : > { %v705_v57 = vadd.f32 %v1146_v54, %v1106_v52  ;;  %v1108_v58 = vpop.f32.mrf.mxu0 }
 0x104   : > { %v1109_v59 = vadd.f32 %v1108_v58, %v1107_v55  ;;  %v1148_v60 = vpop.f32.mrf.mxu1 }
 0x105   : > { %737 = vst [vmem:[%s1497_s5] sm:$0xff] %v705_v57  ;;  %v1149_v61 = vadd.f32 %v1148_v60, %v1147_v56  ;;  %v1110_v62 = vpop.f32.mrf.mxu0  ;;  %v762_v26 = vmul.f32 %v705_v57, %v705_v57 }
 0x106   : > { %v1150_v63 = vpop.f32.mrf.mxu1 }
 0x107   : > { %v708_v0 = vadd.f32 %v1149_v61, %v1109_v59  ;;  %v1111_v1 = vpop.f32.mrf.mxu0 }
 0x108   : > { %v1112_v2 = vadd.f32 %v1111_v1, %v1110_v62  ;;  %v1151_v3 = vpop.f32.mrf.mxu1 }
 0x109   : > { %738 = vst [vmem:[%s1497_s5 + $0x8] sm:$0xff] %v708_v0  ;;  %v1152_v4 = vadd.f32 %v1151_v3, %v1150_v63  ;;  %v1113_v5 = vpop.f32.mrf.mxu0  ;;  %v763_v21 = vmul.f32 %v708_v0, %v708_v0  ;;  %v746_v27 = vadd.f32 %v708_v0, %v705_v57 }
 0x10a   : > { %v1153_v6 = vpop.f32.mrf.mxu1 }
 0x10b   : > { %v713_v7 = vadd.f32 %v1152_v4, %v1112_v2  ;;  %v1114_v8 = vpop.f32.mrf.mxu0  ;;  %v770_v32 = vadd.f32 %v763_v21, %v762_v26 }
 0x10c   : > { %v1115_v9 = vadd.f32 %v1114_v8, %v1113_v5  ;;  %v1154_v10 = vpop.f32.mrf.mxu1  ;;  %v745_v8 = vld [vmem:[#allocation3] sm:$0x1] }
 0x10d   : > { %739 = vst [vmem:[%s1497_s5 + $0x10] sm:$0xff] %v713_v7  ;;  %v1155_v11 = vadd.f32 %v1154_v10, %v1153_v6  ;;  %v1116_v12 = vpop.f32.mrf.mxu0  ;;  %v764_v28 = vmul.f32 %v713_v7, %v713_v7  ;;  %v747_v33 = vadd.f32 %v746_v27, %v713_v7 }
 0x10e   : > { %v1156_v13 = vpop.f32.mrf.mxu1 }
 0x10f   : > { %v716_v14 = vadd.f32 %v1155_v11, %v1115_v9  ;;  %v1117_v15 = vpop.f32.mrf.mxu0  ;;  %v771_v39 = vadd.f32 %v770_v32, %v764_v28  ;;  %v761_v11 = vld [vmem:[#allocation4] sm:$0x1] }
 0x110   : > { %v1118_v16 = vadd.f32 %v1117_v15, %v1116_v12  ;;  %v1157_v17 = vpop.f32.mrf.mxu1 }
 0x111   : > { %740 = vst [vmem:[%s1497_s5 + $0x18] sm:$0xff] %v716_v14  ;;  %v1158_v18 = vadd.f32 %v1157_v17, %v1156_v13  ;;  %v1119_v19 = vpop.f32.mrf.mxu0  ;;  %v765_v34 = vmul.f32 %v716_v14, %v716_v14  ;;  %v748_v40 = vadd.f32 %v747_v33, %v716_v14 }
 0x112   : > { %v1159_v20 = vpop.f32.mrf.mxu1 }
 0x113   : > { %v721_v22 = vadd.f32 %v1158_v18, %v1118_v16  ;;  %v1120_v23 = vpop.f32.mrf.mxu0  ;;  %v772_v45 = vadd.f32 %v771_v39, %v765_v34 }
 0x114   : > { %v1121_v24 = vadd.f32 %v1120_v23, %v1119_v19  ;;  %v1160_v25 = vpop.f32.mrf.mxu1 }
 0x115   : > { %741 = vst [vmem:[%s1497_s5 + $0x20] sm:$0xff] %v721_v22  ;;  %v1161_v29 = vadd.f32 %v1160_v25, %v1159_v20  ;;  %v1122_v30 = vpop.f32.mrf.mxu0  ;;  %v766_v41 = vmul.f32 %v721_v22, %v721_v22  ;;  %v749_v46 = vadd.f32 %v748_v40, %v721_v22 }
 0x116   : > { %v1162_v31 = vpop.f32.mrf.mxu1 }
 0x117   : > { %v724_v35 = vadd.f32 %v1161_v29, %v1121_v24  ;;  %v1123_v36 = vpop.f32.mrf.mxu0  ;;  %v773_v52 = vadd.f32 %v772_v45, %v766_v41 }
 0x118   : > { %v1124_v37 = vadd.f32 %v1123_v36, %v1122_v30  ;;  %v1163_v38 = vpop.f32.mrf.mxu1 }
 0x119   : > { %742 = vst [vmem:[%s1497_s5 + $0x28] sm:$0xff] %v724_v35  ;;  %v1164_v42 = vadd.f32 %v1163_v38, %v1162_v31  ;;  %v1125_v43 = vpop.f32.mrf.mxu0  ;;  %v767_v47 = vmul.f32 %v724_v35, %v724_v35  ;;  %v750_v53 = vadd.f32 %v749_v46, %v724_v35 }
 0x11a   : > { %v1165_v44 = vpop.f32.mrf.mxu1 }
 0x11b   : > { %v729_v48 = vadd.f32 %v1164_v42, %v1124_v37  ;;  %v1126_v49 = vpop.f32.mrf.mxu0  ;;  %v774_v56 = vadd.f32 %v773_v52, %v767_v47 }
 0x11c   : > { %v1127_v50 = vadd.f32 %v1126_v49, %v1125_v43  ;;  %v1166_v51 = vpop.f32.mrf.mxu1 }
 0x11d   : > { %743 = vst [vmem:[%s1497_s5 + $0x30] sm:$0xff] %v729_v48  ;;  %v768_v54 = vmul.f32 %v729_v48, %v729_v48  ;;  %v1167_v55 = vadd.f32 %v1166_v51, %v1165_v44  ;;  %v751_v57 = vadd.f32 %v750_v53, %v729_v48 }
 0x11f   : > { %v732_v58 = vadd.f32 %v1167_v55, %v1127_v50  ;;  %v775_v59 = vadd.f32 %v774_v56, %v768_v54 }
 0x121   : > { %744 = vst [vmem:[%s1497_s5 + $0x38] sm:$0xff] %v732_v58  ;;  %v752_v60 = vadd.f32 %v751_v57, %v732_v58  ;;  %v769_v61 = vmul.f32 %v732_v58, %v732_v58 }
 0x123   : > { %v753_v62 = vrot.slane %v752_v60, 4  ;;  %v776_v63 = vadd.f32 %v775_v59, %v769_v61 }
 0x125   : > { %v754_v0 = vadd.f32 %v753_v62, %v752_v60  ;;  %v777_v1 = vrot.slane %v776_v63, 4 }
 0x127   : > { %v755_v2 = vrot.slane %v754_v0, 2  ;;  %v778_v3 = vadd.f32 %v777_v1, %v776_v63 }
 0x129   : > { %v756_v4 = vadd.f32 %v755_v2, %v754_v0  ;;  %v779_v5 = vrot.slane %v778_v3, 2 }
 0x12b   : > { %v757_v6 = vrot.slane %v756_v4, 1  ;;  %v780_v7 = vadd.f32 %v779_v5, %v778_v3 }
 0x12d   : > { %v758_v9 = vadd.f32 %v757_v6, %v756_v4  ;;  %v781_v10 = vrot.slane %v780_v7, 1 }
 0x12f   : > { %v759_v12 = vadd.f32 %v758_v9, %v745_v8  ;;  %v782_v13 = vadd.f32 %v781_v10, %v780_v7 }
 0x131   : > { %760 = vst [vmem:[#allocation3] sm:$0x1] %v759_v12  ;;  %v783_v14 = vadd.f32 %v782_v13, %v761_v11 }
 0x133   : > { %784 = vst [vmem:[#allocation4] sm:$0x1] %v783_v14 }
 0x134 PF: > { %p1041_p9 = scmp.ne.s32.totalorder %s1293_s16, 1 }
 0x135   : > { %p1042_p10 = scmp.ne.s32.totalorder (!%p1041_p9), %s1289_s15, 0 }
 0x136   : > { %788 = sbr.rel (%p1041_p9) target bundleno = 371 (0x173), region = 48 }
 0x13b   : > { %792 = sbr.rel (%p1042_p10) target bundleno = 352 (0x160), region = 52 }
 0x140   : > { %v793_v15 = vld [vmem:[#allocation3] sm:$0x1]  ;;  %v795_v16 = vld [vmem:[#allocation4] sm:$0x1] }
 0x141   : > { %v794_v17 = vmul.f32 0.010204081, %v793_v15  ;;  %v796_v18 = vmul.f32 0.010204081, %v795_v16  ;;  %v802_v23 = vld [vmem:[%s1537_s2] sm:$0x1] }
 0x142   : > { %v804_v26 = vld [vmem:[%s1538_s3] sm:$0x1] }
 0x143   : > { %v797_v19 = vmul.f32 %v794_v17, %v794_v17 }
 0x145   : > { %v798_v20 = vsub.f32 %v796_v18, %v797_v19 }
 0x147   : > { %v799_v21 = vmax.f32 %v798_v20, 0.0 }
 0x149   : > { %v800_v22 = vadd.f32 1e-05, %v799_v21 }
 0x14b   : > { %1265 = vrsqrt.f32 %v800_v22 }
 0x158   : > { %v1266_v24 = vpop.eup %1265 }
 0x159   : > { %v803_v25 = vmul.f32 %v1266_v24, %v802_v23 }
 0x15b   : > { %807 = vst [vmem:[#allocation3] sm:$0x1] %v803_v25  ;;  %v805_v27 = vmul.f32 %v803_v25, %v794_v17 }
 0x15d   : > { %v806_v28 = vsub.f32 %v804_v26, %v805_v27 }
 0x15f   : > { %808 = vst [vmem:[#allocation4] sm:$0x1] %v806_v28 }
 0x160 PF: > { %s1043_s10 = sshll.u32 %s1289_s15, 6 }
 0x161   : > { %s810_s11 = scalar_lea.vmem [#allocation2], %s1043_s10 }
 0x162   : > { %v1044_v29 = vld [vmem:[#allocation3] ss:$0 sm:$0xff]  ;;  %v812_v32 = vld [vmem:[%s810_s11 + $0x8] sm:$0xff]  ;;  %v813_v33 = vld [vmem:[%s810_s11 + $0x10] sm:$0xff] }
 0x163   : > { %v811_v31 = vld [vmem:[%s810_s11] sm:$0xff]  ;;  %v827_v35 = vmul.f32 %v1044_v29, %v812_v32  ;;  %v814_v36 = vld [vmem:[%s810_s11 + $0x18] sm:$0xff]  ;;  %v828_v37 = vmul.f32 %v1044_v29, %v813_v33  ;;  %v816_v39 = vld [vmem:[%s810_s11 + $0x28] sm:$0xff] }
 0x164   : > { %v826_v34 = vmul.f32 %v1044_v29, %v811_v31  ;;  %v815_v38 = vld [vmem:[%s810_s11 + $0x20] sm:$0xff]  ;;  %v829_v40 = vmul.f32 %v1044_v29, %v814_v36  ;;  %v831_v42 = vmul.f32 %v1044_v29, %v816_v39  ;;  %v817_v43 = vld [vmem:[%s810_s11 + $0x30] sm:$0xff]  ;;  %v818_v44 = vld [vmem:[%s810_s11 + $0x38] sm:$0xff] }
 0x165   : > { %v830_v41 = vmul.f32 %v1044_v29, %v815_v38  ;;  %v832_v48 = vmul.f32 %v1044_v29, %v817_v43  ;;  %v833_v52 = vmul.f32 %v1044_v29, %v818_v44 }
 0x166   : > { %v1045_v30 = vld [vmem:[#allocation4] ss:$0 sm:$0xff] }
 0x167   : > { %v841_v45 = vadd.f32 %v1045_v30, %v826_v34  ;;  %v842_v46 = vadd.f32 %v1045_v30, %v827_v35  ;;  %v843_v47 = vadd.f32 %v1045_v30, %v828_v37  ;;  %v844_v49 = vadd.f32 %v1045_v30, %v829_v40 }
 0x168   : > { %v845_v50 = vadd.f32 %v1045_v30, %v830_v41  ;;  %v846_v51 = vadd.f32 %v1045_v30, %v831_v42  ;;  %v847_v56 = vadd.f32 %v1045_v30, %v832_v48  ;;  %v848_v60 = vadd.f32 %v1045_v30, %v833_v52 }
 0x169   : > { %v849_v53 = vmul.f32 0.2, %v841_v45  ;;  %v850_v54 = vmul.f32 0.2, %v842_v46  ;;  %v851_v55 = vmul.f32 0.2, %v843_v47 }
 0x16a   : > { %v852_v57 = vmul.f32 0.2, %v844_v49  ;;  %v853_v58 = vmul.f32 0.2, %v845_v50  ;;  %v854_v59 = vmul.f32 0.2, %v846_v51 }
 0x16b   : > { %v857_v61 = vmax.f32 %v841_v45, %v849_v53  ;;  %v858_v62 = vmax.f32 %v842_v46, %v850_v54  ;;  %v859_v63 = vmax.f32 %v843_v47, %v851_v55  ;;  %v855_v0 = vmul.f32 0.2, %v847_v56 }
 0x16c   : > { %v860_v1 = vmax.f32 %v844_v49, %v852_v57  ;;  %v861_v2 = vmax.f32 %v845_v50, %v853_v58  ;;  %v862_v3 = vmax.f32 %v846_v51, %v854_v59  ;;  %v856_v4 = vmul.f32 0.2, %v848_v60 }
 0x16d   : > { %v1068_v5 = vpack.c.bf16 %v858_v62, %v857_v61  ;;  %v863_v6 = vmax.f32 %v847_v56, %v855_v0 }
 0x16e   : > { %v1073_v7 = vpack.c.bf16 %v860_v1, %v859_v63  ;;  %v1078_v8 = vpack.c.bf16 %v862_v3, %v861_v2  ;;  %v864_v9 = vmax.f32 %v848_v60, %v856_v4 }
 0x16f   : > { %1069 = vst [vmem:[%s1375_s6] sm:$0xff] %v1068_v5  }
 0x170   : > { %1085 = vst [vmem:[%s1375_s6 + $0x8] sm:$0xff] %v1073_v7   ;;  %1086 = vst [vmem:[%s1375_s6 + $0x10] sm:$0xff] %v1078_v8   ;;  %v1083_v10 = vpack.c.bf16 %v864_v9, %v863_v6 }
 0x172   : > { %1087 = vst [vmem:[%s1375_s6 + $0x18] sm:$0xff] %v1083_v10  }
 0x173 PF: > { %s14_s19 = sadd.s32 1, %s1305_s19   ;;  %s1540_s15 = smov %s1297_s17 }
 0x174   : > { %p11_p11 = scmp.ge.s32.totalorder %s14_s19, 6   ;;  %s1541_s16 = smov %s1301_s18 }
 0x175   : > { %s1542_s17 = smov %s1545_s20  ;;  %s1543_s18 = smov %s1549_s21 }
 0x176   :  { %13 = sbr.rel (!%p11_p11) target bundleno = 3 (0x3), region = 84 }

// kernel: mnist_disc_forward.7
= control target key start
LH: loop header
LB: loop body
LE: loop exit
PB: predicated region body
PF: predicated region fallthrough
CT: control target
= control target key end

     0   :  { %s1196_s15 = smov 0   ;;  %s1198_s16 = smov 0   ;;  %s1398_s0 = inlined_call_operand.vmem [shape: bf16[32,640], index: 0, kind: input, shape index: {}]   ;;  %s1399_s1 = inlined_call_operand.vmem [shape: bf16[640,128], index: 1, kind: input, shape index: {}]   ;;  %s1400_s2 = inlined_call_operand.vmem [shape: f32[1,128], index: 2, kind: input, shape index: {}]   ;;  %s1401_s3 = inlined_call_operand.vmem [shape: f32[1,128], index: 3, kind: input, shape index: {}]   ;;  %s1402_s4 = inlined_call_operand.vmem [shape: bf16[32,128], index: 4, kind: output, shape index: {}]  }
   0x1   :  { %s1200_s17 = smov 0   ;;  %s1202_s18 = smov 0  }
   0x2   :  { %s1204_s19 = smov 0  }
   0x3 LB: > { %s23_s20 = sadd.s32 1, %s1158_s17  ;;  %s26_s21 = sadd.s32 1, %s1162_s18  ;;  %s1166_s19 = sphi %s1204_s19, %s14_s19   ;;  %s1162_s18 = sphi %s1202_s18, %s1406_s18   ;;  %s1158_s17 = sphi %s1200_s17, %s1405_s17   ;;  %s1154_s16 = sphi %s1198_s16, %s1404_s16   ;;  %s1150_s15 = sphi %s1196_s15, %s1403_s15  }
   0x4   : > { %p24_p0 = scmp.ge.s32.totalorder %s23_s20, 2  ;;  %p893_p1 = scmp.ge.s32.totalorder %s1166_s19, 1 }
   0x5   : > { %p190_p2 = scmp.lt.s32.totalorder %s1166_s19, 5 }
   0x6   : > { %s1408_s20 = smov (%p24_p0, %s23_s20), 0  ;;  %s1410_s21 = smov (!%p24_p0, %s26_s21), %s1162_s18 }
   0x7   : > { %p191_p3 = pnand %p893_p1, %p190_p2  ;;  %p28_p4 = scmp.ge.s32.totalorder %s1410_s21, 2 }
   0x8   : > { %s221_s22 = ssub.s32 (!%p191_p3), 1, %s1154_s16  ;;  %s234_s23 = smul.u32 (!%p191_p3), %s1150_s15, %s1154_s16 }
   0x9   : > { %s1412_s21 = smov (%p28_p4, %s1410_s21), 0  ;;  %194 = sbr.rel (%p191_p3) target bundleno = 371 (0x173), region = 36 }
   0xa   : > { %s222_s24 = smul.u32 (!%p191_p3), %s1150_s15, %s221_s22  ;;  %s896_s25 = sshll.u32 (!%p191_p3), %s234_s23, 1 }
   0xb   : > { %p236_p5 = scmp.lt.s32.totalorder (!%p191_p3), %s896_s25, 3  ;;  %p898_p7 = scmp.ne.s32.totalorder (!%p191_p3), %s1154_s16, 0 }
   0xc   : > { %s223_s26 = sadd.s32 (!%p191_p3), %s1154_s16, %s222_s24 }
   0xd   : > { %s894_s27 = sshll.u32 (!%p191_p3), %s223_s26, 1 }
   0xe   : > { %p225_p6 = scmp.lt.s32.totalorder %s894_s27, 3  ;;  %s1414_s25 = smov (!%p236_p5, %s896_s25), 3 }
   0xf   : > { %s897_s28 = sshll.u32 %s1414_s25, 2  ;;  %246 = sbr.rel (%p898_p7) target bundleno = 311 (0x137), region = 40 }
  0x10   : > { %s1416_s27 = smov (!%p225_p6, %s894_s27), 3  ;;  %s1238_s6 = scalar_lea.vmem %s1402_s4, %s897_s28 }
  0x11   : > { %s1035_s29 = smul.u32 20, %s1416_s27  ;;  %p899_p8 = scmp.ne.s32.totalorder (!%p898_p7), %s1150_s15, 0 }
  0x13   : > { %s1243_s9 = scalar_lea.vmem %s1398_s0, %s1035_s29 }
  0x14   : > { %250 = sbr.rel (%p899_p8) target bundleno = 27 (0x1b), region = 44 }
  0x19   : > { %v1168_v0 = vmov 0.0  }
  0x1a   : > { %251 = vst [vmem:[#allocation3] sm:$0x1] %v1168_v0  ;;  %252 = vst [vmem:[#allocation4] sm:$0x1] %v1168_v0 }
  0x1b PF: > { %v1079_v1 = vld [vmem:[%s1399_s1 + $0x78] sm:$0xff]   ;;  %v1083_v5 = vld [vmem:[%s1399_s1 + $0x70] sm:$0xff]   ;;  %v1087_v9 = vld [vmem:[%s1399_s1 + $0x68] sm:$0xff]   ;;  %v1169_v35 = vmov 0.0   ;;  %vm1170_vm0 = vmmov 0   ;;  %s945_s29 = sshll.u32 %s1150_s15, 4 }
  0x1c   : > { %v1080_v2 = vld [vmem:[%s1399_s1 + $0xf8] sm:$0xff]   ;;  %962 = vmatprep.subr.bf16.mxu0 %v1079_v1  ;;  %v1084_v6 = vld [vmem:[%s1399_s1 + $0xf0] sm:$0xff]   ;;  %v1088_v10 = vld [vmem:[%s1399_s1 + $0xe8] sm:$0xff]  }
  0x1d   : > { %v1081_v3 = vld [vmem:[%s1399_s1 + $0x38] sm:$0xff]   ;;  %984 = vmatprep.subr.bf16.mxu1 %v1080_v2  ;;  %v1085_v7 = vld [vmem:[%s1399_s1 + $0x30] sm:$0xff]   ;;  %v1089_v11 = vld [vmem:[%s1399_s1 + $0x28] sm:$0xff]  }
  0x1e   : > { %v1082_v4 = vld [vmem:[%s1399_s1 + $0xb8] sm:$0xff]   ;;  %963 = vmatpush3.bf16.msra.mxu0 %v1081_v3  ;;  %v1086_v8 = vld [vmem:[%s1399_s1 + $0xb0] sm:$0xff]   ;;  %v1090_v12 = vld [vmem:[%s1399_s1 + $0xa8] sm:$0xff]  }
  0x1f   : > { %985 = vmatpush3.bf16.msra.mxu1 %v1082_v4  ;;  %964 = vmatprep.subr.bf16.mxu0 %v1083_v5  ;;  %v1091_v13 = vld [vmem:[%s1399_s1 + $0x60] sm:$0xff]   ;;  %v1095_v17 = vld [vmem:[%s1399_s1 + $0x58] sm:$0xff]   ;;  %v1099_v21 = vld [vmem:[%s1399_s1 + $0x50] sm:$0xff]  }
  0x20   : > { %986 = vmatprep.subr.bf16.mxu1 %v1084_v6  ;;  %v1092_v14 = vld [vmem:[%s1399_s1 + $0xe0] sm:$0xff]   ;;  %v1096_v18 = vld [vmem:[%s1399_s1 + $0xd8] sm:$0xff]   ;;  %v1100_v22 = vld [vmem:[%s1399_s1 + $0xd0] sm:$0xff]  }
  0x21   : > { %v1093_v15 = vld [vmem:[%s1399_s1 + $0x20] sm:$0xff]   ;;  %v1097_v19 = vld [vmem:[%s1399_s1 + $0x18] sm:$0xff]   ;;  %v1101_v23 = vld [vmem:[%s1399_s1 + $0x10] sm:$0xff]  }
  0x22   : > { %965 = vmatpush3.bf16.msra.mxu0 %v1085_v7  ;;  %v1094_v16 = vld [vmem:[%s1399_s1 + $0xa0] sm:$0xff]   ;;  %v1098_v20 = vld [vmem:[%s1399_s1 + $0x98] sm:$0xff]   ;;  %v1102_v24 = vld [vmem:[%s1399_s1 + $0x90] sm:$0xff]  }
  0x23   : > { %987 = vmatpush3.bf16.msra.mxu1 %v1086_v8  ;;  %966 = vmatprep.subr.bf16.mxu0 %v1087_v9  ;;  %v1103_v25 = vld [vmem:[%s1399_s1 + $0x48] sm:$0xff]   ;;  %v1107_v29 = vld [vmem:[%s1399_s1 + $0x40] sm:$0xff]   ;;  %v1117_v38 = vld [vmem:[%s1399_s1 + $0x138] sm:$0xff]  }
  0x24   : > { %988 = vmatprep.subr.bf16.mxu1 %v1088_v10  ;;  %v1104_v26 = vld [vmem:[%s1399_s1 + $0xc8] sm:$0xff]   ;;  %v1108_v30 = vld [vmem:[%s1399_s1 + $0xc0] sm:$0xff]   ;;  %v1118_v39 = vld [vmem:[%s1399_s1 + $0x130] sm:$0xff]  }
  0x25   : > { %v1105_v27 = vld [vmem:[%s1399_s1 + $0x8] sm:$0xff]   ;;  %v1109_v31 = vld [vmem:[%s1399_s1] sm:$0xff]   ;;  %v1121_v42 = vld [vmem:[%s1399_s1 + $0x118] sm:$0xff]  }
  0x26   : > { %967 = vmatpush3.bf16.msra.mxu0 %v1089_v11  ;;  %v1106_v28 = vld [vmem:[%s1399_s1 + $0x88] sm:$0xff]   ;;  %v1110_v32 = vld [vmem:[%s1399_s1 + $0x80] sm:$0xff]   ;;  %v1122_v43 = vld [vmem:[%s1399_s1 + $0x110] sm:$0xff]  }
  0x27   : > { %989 = vmatpush3.bf16.msra.mxu1 %v1090_v12  ;;  %968 = vmatprep.subr.bf16.mxu0 %v1091_v13  ;;  %v1111_v33 = vld [vmem:[%s1243_s9] ss:$20 sps:$4 sm:$0xff]   ;;  %v1113_v34 = vld [vmem:[%s1243_s9 + $0x4] ss:$20 sps:$4 sm:$0xff]   ;;  %v1114_v36 = vld [vmem:[%s1243_s9 + $0x8] ss:$20 sps:$4 sm:$0xff]  }
  0x28   : > { %990 = vmatprep.subr.bf16.mxu1 %v1092_v14  ;;  %v1116_v37 = vld [vmem:[%s1243_s9 + $0xc] ss:$20 sps:$4 sm:$0xff]   ;;  %637 = vmatprep.mubr.bf16.mxu0 %v1113_v34  ;;  %v1125_v46 = vld [vmem:[%s1243_s9 + $0x10] ss:$20 sps:$4 sm:$0xff]   ;;  %s729_s9 = scalar_lea.vmem [#allocation2], %s945_s29 }
  0x29   : > { %678 = vmatprep.mubr.bf16.mxu1 %v1116_v37  ;;  %v1119_v40 = vld [vmem:[%s1399_s1 + $0x128] sm:$0xff]   ;;  %v1120_v41 = vld [vmem:[%s1399_s1 + $0x120] sm:$0xff]  }
  0x2a   : > { %969 = vmatpush3.bf16.msra.mxu0 %v1093_v15  ;;  %v1123_v44 = vld [vmem:[%s1399_s1 + $0x108] sm:$0xff]   ;;  %v1124_v45 = vld [vmem:[%s1399_s1 + $0x100] sm:$0xff]  }
  0x2b   : > { %991 = vmatpush3.bf16.msra.mxu1 %v1094_v16  ;;  %970 = vmatprep.subr.bf16.mxu0 %v1095_v17  ;;  %v732_v16 = vld [vmem:[#allocation3] sm:$0x1] }
  0x2c   : > { %992 = vmatprep.subr.bf16.mxu1 %v1096_v18 }
  0x2e   : > { %971 = vmatpush3.bf16.msra.mxu0 %v1097_v19  ;;  %v742_v19 = vld [vmem:[#allocation4] sm:$0x1] }
  0x2f   : > { %993 = vmatpush3.bf16.msra.mxu1 %v1098_v20  ;;  %972 = vmatprep.subr.bf16.mxu0 %v1099_v21 }
  0x30   : > { %994 = vmatprep.subr.bf16.mxu1 %v1100_v22 }
  0x32   : > { %973 = vmatpush3.bf16.msra.mxu0 %v1101_v23 }
  0x33   : > { %995 = vmatpush3.bf16.msra.mxu1 %v1102_v24  ;;  %974 = vmatprep.subr.bf16.mxu0 %v1103_v25 }
  0x34   : > { %996 = vmatprep.subr.bf16.mxu1 %v1104_v26 }
  0x36   : > { %975 = vmatpush3.bf16.msra.mxu0 %v1105_v27 }
  0x37   : > { %997 = vmatpush3.bf16.msra.mxu1 %v1106_v28  ;;  %976 = vmatprep.subr.bf16.mxu0 %v1107_v29 }
  0x38   : > { %998 = vmatprep.subr.bf16.mxu1 %v1108_v30 }
  0x3a   : > { %977 = vmatpush3.bf16.msra.mxu0 %v1109_v31 }
  0x3b   : > { %999 = vmatpush3.bf16.msra.mxu1 %v1110_v32  ;;  %1015 = vmatprep.subr.bf16.mxu0 %v1169_v35 }
  0x3d   : > { %638 = vmatmul.mubr.bf16.vlgmr.msra.gmra.mxu0 %v1111_v33 }
  0x3e   : > { %679 = vmatmul.mubr.bf16.vlgmr.msra.gmra.mxu1 %v1114_v36  ;;  %1016 = vmatpush3.bf16.msra.mxu0 %v1117_v38 }
  0x3f   : > { %1017 = vmatprep.subr.bf16.mxu0 %v1169_v35  ;;  %1031 = vmatprep.mubr.msk.bf16.mxu0 %vm1170_vm0, %v1169_v35 }
  0x42   : > { %1018 = vmatpush3.bf16.msra.mxu0 %v1118_v39 }
  0x43   : > { %1019 = vmatprep.subr.bf16.mxu0 %v1169_v35 }
  0x46   : > { %1020 = vmatpush3.bf16.msra.mxu0 %v1119_v40 }
  0x47   : > { %1021 = vmatprep.subr.bf16.mxu0 %v1169_v35 }
  0x4a   : > { %1022 = vmatpush3.bf16.msra.mxu0 %v1120_v41 }
  0x4b   : > { %1023 = vmatprep.subr.bf16.mxu0 %v1169_v35 }
  0x4e   : > { %1024 = vmatpush3.bf16.msra.mxu0 %v1121_v42 }
  0x4f   : > { %1025 = vmatprep.subr.bf16.mxu0 %v1169_v35 }
  0x52   : > { %1026 = vmatpush3.bf16.msra.mxu0 %v1122_v43 }
  0x53   : > { %1027 = vmatprep.subr.bf16.mxu0 %v1169_v35 }
  0x56   : > { %1028 = vmatpush3.bf16.msra.mxu0 %v1123_v44 }
  0x57   : > { %1029 = vmatprep.subr.bf16.mxu0 %v1169_v35 }
  0x5a   : > { %1030 = vmatpush3.bf16.msra.mxu0 %v1124_v45 }
  0x5d   : > { %1032 = vmatmul.mubr.bf16.vlgmr.msra.gmra.mxu0 %v1125_v46 }
  0xfd   : > { %v978_v47 = vpop.f32.mrf.mxu0 }
  0xfe   : > { %v1000_v48 = vpop.f32.mrf.mxu1 }
  0xff   : > { %v979_v49 = vpop.f32.mrf.mxu0 }
 0x100   : > { %v1001_v50 = vpop.f32.mrf.mxu1  ;;  %v980_v53 = vadd.f32 %v979_v49, %v978_v47 }
 0x101   : > { %v981_v51 = vpop.f32.mrf.mxu0  ;;  %v1002_v54 = vadd.f32 %v1001_v50, %v1000_v48 }
 0x102   : > { %v1003_v52 = vpop.f32.mrf.mxu1 }
 0x103   : > { %v982_v55 = vpop.f32.mrf.mxu0  ;;  %v681_v59 = vadd.f32 %v1002_v54, %v980_v53 }
 0x104   : > { %v1004_v56 = vpop.f32.mrf.mxu1  ;;  %v983_v57 = vadd.f32 %v982_v55, %v981_v51 }
 0x105   : > { %v1005_v58 = vadd.f32 %v1004_v56, %v1003_v52 }
 0x107   : > { %v684_v63 = vadd.f32 %v1005_v58, %v983_v57 }
 0x11d   : > { %v721_v60 = vpop.f32.mrf.mxu0 }
 0x11e   : > { %v722_v61 = vadd.f32 %v721_v60, %v681_v59 }
 0x11f   : > { %v1033_v62 = vpop.f32.mrf.mxu0 }
 0x120   : > { %730 = vst [vmem:[%s729_s9] sm:$0xff] %v722_v61  ;;  %v743_v3 = vmul.f32 %v722_v61, %v722_v61 }
 0x121   : > { %v724_v0 = vpop.f32.mrf.mxu0 }
 0x122   : > { %v725_v1 = vadd.f32 %v724_v0, %v684_v63 }
 0x123   : > { %v1034_v2 = vpop.f32.mrf.mxu0 }
 0x124   : > { %731 = vst [vmem:[%s729_s9 + $0x8] sm:$0xff] %v725_v1  ;;  %v733_v4 = vadd.f32 %v725_v1, %v722_v61  ;;  %v744_v5 = vmul.f32 %v725_v1, %v725_v1 }
 0x126   : > { %v734_v6 = vrot.slane %v733_v4, 4  ;;  %v745_v7 = vadd.f32 %v744_v5, %v743_v3 }
 0x128   : > { %v735_v8 = vadd.f32 %v734_v6, %v733_v4  ;;  %v746_v9 = vrot.slane %v745_v7, 4 }
 0x12a   : > { %v736_v10 = vrot.slane %v735_v8, 2  ;;  %v747_v11 = vadd.f32 %v746_v9, %v745_v7 }
 0x12c   : > { %v737_v12 = vadd.f32 %v736_v10, %v735_v8  ;;  %v748_v13 = vrot.slane %v747_v11, 2 }
 0x12e   : > { %v738_v14 = vrot.slane %v737_v12, 1  ;;  %v749_v15 = vadd.f32 %v748_v13, %v747_v11 }
 0x130   : > { %v739_v17 = vadd.f32 %v738_v14, %v737_v12  ;;  %v750_v18 = vrot.slane %v749_v15, 1 }
 0x132   : > { %v740_v20 = vadd.f32 %v739_v17, %v732_v16  ;;  %v751_v21 = vadd.f32 %v750_v18, %v749_v15 }
 0x134   : > { %741 = vst [vmem:[#allocation3] sm:$0x1] %v740_v20  ;;  %v752_v22 = vadd.f32 %v751_v21, %v742_v19 }
 0x136   : > { %753 = vst [vmem:[#allocation4] sm:$0x1] %v752_v22 }
 0x137 PF: > { %p946_p9 = scmp.ne.s32.totalorder %s1154_s16, 1 }
 0x138   : > { %p947_p10 = scmp.ne.s32.totalorder (!%p946_p9), %s1150_s15, 0 }
 0x139   : > { %757 = sbr.rel (%p946_p9) target bundleno = 371 (0x173), region = 48 }
 0x13e   : > { %761 = sbr.rel (%p947_p10) target bundleno = 355 (0x163), region = 52 }
 0x143   : > { %v762_v23 = vld [vmem:[#allocation3] sm:$0x1]  ;;  %v764_v24 = vld [vmem:[#allocation4] sm:$0x1] }
 0x144   : > { %v763_v25 = vmul.f32 0.03125, %v762_v23  ;;  %v765_v26 = vmul.f32 0.03125, %v764_v24  ;;  %v771_v31 = vld [vmem:[%s1400_s2] sm:$0x1] }
 0x145   : > { %v773_v34 = vld [vmem:[%s1401_s3] sm:$0x1] }
 0x146   : > { %v766_v27 = vmul.f32 %v763_v25, %v763_v25 }
 0x148   : > { %v767_v28 = vsub.f32 %v765_v26, %v766_v27 }
 0x14a   : > { %v768_v29 = vmax.f32 %v767_v28, 0.0 }
 0x14c   : > { %v769_v30 = vadd.f32 1e-05, %v768_v29 }
 0x14e   : > { %1126 = vrsqrt.f32 %v769_v30 }
 0x15b   : > { %v1127_v32 = vpop.eup %1126 }
 0x15c   : > { %v772_v33 = vmul.f32 %v1127_v32, %v771_v31 }
 0x15e   : > { %776 = vst [vmem:[#allocation3] sm:$0x1] %v772_v33  ;;  %v774_v35 = vmul.f32 %v772_v33, %v763_v25 }
 0x160   : > { %v775_v36 = vsub.f32 %v773_v34, %v774_v35 }
 0x162   : > { %777 = vst [vmem:[#allocation4] sm:$0x1] %v775_v36 }
 0x163 PF: > { %s948_s8 = sshll.u32 %s1150_s15, 4 }
 0x164   : > { %s779_s10 = scalar_lea.vmem [#allocation2], %s948_s8 }
 0x165   : > { %v949_v37 = vld [vmem:[#allocation3] ss:$0 sm:$0xff]  ;;  %v781_v39 = vld [vmem:[%s779_s10 + $0x8] sm:$0xff] }
 0x166   : > { %v780_v38 = vld [vmem:[%s779_s10] sm:$0xff]  ;;  %v790_v42 = vmul.f32 %v949_v37, %v781_v39 }
 0x167   : > { %v789_v41 = vmul.f32 %v949_v37, %v780_v38 }
 0x169   : > { %v950_v40 = vld [vmem:[#allocation4] ss:$0 sm:$0xff] }
 0x16a   : > { %v798_v43 = vadd.f32 %v950_v40, %v789_v41  ;;  %v799_v44 = vadd.f32 %v950_v40, %v790_v42 }
 0x16c   : > { %v800_v45 = vmul.f32 0.2, %v798_v43  ;;  %v801_v46 = vmul.f32 0.2, %v799_v44 }
 0x16e   : > { %v802_v47 = vmax.f32 %v798_v43, %v800_v45  ;;  %v803_v48 = vmax.f32 %v799_v44, %v801_v46 }
 0x170   : > { %v960_v49 = vpack.c.bf16 %v803_v48, %v802_v47 }
 0x172   : > { %961 = vst [vmem:[%s1238_s6] sm:$0xff] %v960_v49  }
 0x173 PF: > { %s14_s19 = sadd.s32 1, %s1166_s19   ;;  %s1403_s15 = smov %s1158_s17 }
 0x174   : > { %p11_p11 = scmp.ge.s32.totalorder %s14_s19, 6   ;;  %s1404_s16 = smov %s1162_s18 }
 0x175   : > { %s1405_s17 = smov %s1408_s20  ;;  %s1406_s18 = smov %s1412_s21 }
 0x176   :  { %13 = sbr.rel (!%p11_p11) target bundleno = 3 (0x3), region = 84 }

// kernel: mnist_disc_forward.8
= control target key start
LH: loop header
LB: loop body
LE: loop exit
PB: predicated region body
PF: predicated region fallthrough
CT: control target
= control target key end

     0   :  { %s2041_s1 = inlined_call_operand.vmem [shape: bf16[1152,256], index: 1, kind: input, shape index: {}]   ;;  %s2042_s0 = inlined_call_operand.vmem [shape: bf16[16,1152], index: 0, kind: input, shape index: {}]   ;;  %s2043_s2 = inlined_call_operand.vmem [shape: bf16[16,256], index: 2, kind: output, shape index: {}]  }
   0x1   :  { %v1331_v0 = vld [vmem:[%s2041_s1 + $0x74] ss:$8 sps:$4 sm:$0xff]   ;;  %v1335_v2 = vld [vmem:[%s2041_s1 + $0x70] ss:$8 sps:$4 sm:$0xff]   ;;  %v1337_v4 = vld [vmem:[%s2041_s1 + $0x64] ss:$8 sps:$4 sm:$0xff]  }
   0x2   :  { %v1333_v1 = vld [vmem:[%s2041_s1 + $0x174] ss:$8 sps:$4 sm:$0xff]   ;;  %932 = vmatprep.subr.bf16.mxu0 %v1331_v0  ;;  %v1336_v3 = vld [vmem:[%s2041_s1 + $0x170] ss:$8 sps:$4 sm:$0xff]   ;;  %v1339_v5 = vld [vmem:[%s2041_s1 + $0x164] ss:$8 sps:$4 sm:$0xff]  }
   0x3   :  { %975 = vmatprep.subr.bf16.mxu1 %v1333_v1  ;;  %933 = vmatpush1.bf16.msra.mxu0 %v1335_v2  ;;  %v1341_v6 = vld [vmem:[%s2041_s1 + $0x60] ss:$8 sps:$4 sm:$0xff]   ;;  %v1343_v8 = vld [vmem:[%s2041_s1 + $0x54] ss:$8 sps:$4 sm:$0xff]   ;;  %v1347_v10 = vld [vmem:[%s2041_s1 + $0x50] ss:$8 sps:$4 sm:$0xff]  }
   0x4   :  { %976 = vmatpush1.bf16.msra.mxu1 %v1336_v3  ;;  %934 = vmatprep.subr.bf16.mxu0 %v1337_v4  ;;  %v1342_v7 = vld [vmem:[%s2041_s1 + $0x160] ss:$8 sps:$4 sm:$0xff]   ;;  %v1345_v9 = vld [vmem:[%s2041_s1 + $0x154] ss:$8 sps:$4 sm:$0xff]   ;;  %v1348_v11 = vld [vmem:[%s2041_s1 + $0x150] ss:$8 sps:$4 sm:$0xff]  }
   0x5   :  { %977 = vmatprep.subr.bf16.mxu1 %v1339_v5  ;;  %v1349_v12 = vld [vmem:[%s2041_s1 + $0x44] ss:$8 sps:$4 sm:$0xff]   ;;  %v1353_v14 = vld [vmem:[%s2041_s1 + $0x40] ss:$8 sps:$4 sm:$0xff]   ;;  %v1355_v16 = vld [vmem:[%s2041_s1 + $0x34] ss:$8 sps:$4 sm:$0xff]  }
   0x6   :  { %v1351_v13 = vld [vmem:[%s2041_s1 + $0x144] ss:$8 sps:$4 sm:$0xff]   ;;  %v1354_v15 = vld [vmem:[%s2041_s1 + $0x140] ss:$8 sps:$4 sm:$0xff]   ;;  %v1357_v17 = vld [vmem:[%s2041_s1 + $0x134] ss:$8 sps:$4 sm:$0xff]  }
   0x7   :  { %935 = vmatpush1.bf16.msra.mxu0 %v1341_v6  ;;  %v1359_v18 = vld [vmem:[%s2041_s1 + $0x30] ss:$8 sps:$4 sm:$0xff]   ;;  %v1361_v20 = vld [vmem:[%s2041_s1 + $0x24] ss:$8 sps:$4 sm:$0xff]   ;;  %v1365_v22 = vld [vmem:[%s2041_s1 + $0x20] ss:$8 sps:$4 sm:$0xff]  }
   0x8   :  { %978 = vmatpush1.bf16.msra.mxu1 %v1342_v7  ;;  %936 = vmatprep.subr.bf16.mxu0 %v1343_v8  ;;  %v1360_v19 = vld [vmem:[%s2041_s1 + $0x130] ss:$8 sps:$4 sm:$0xff]   ;;  %v1363_v21 = vld [vmem:[%s2041_s1 + $0x124] ss:$8 sps:$4 sm:$0xff]   ;;  %v1366_v23 = vld [vmem:[%s2041_s1 + $0x120] ss:$8 sps:$4 sm:$0xff]  }
   0x9   :  { %979 = vmatprep.subr.bf16.mxu1 %v1345_v9  ;;  %v1367_v24 = vld [vmem:[%s2041_s1 + $0x14] ss:$8 sps:$4 sm:$0xff]   ;;  %v1371_v26 = vld [vmem:[%s2041_s1 + $0x10] ss:$8 sps:$4 sm:$0xff]   ;;  %v1373_v28 = vld [vmem:[%s2041_s1 + $0x4] ss:$8 sps:$4 sm:$0xff]  }
   0xa   :  { %v1369_v25 = vld [vmem:[%s2041_s1 + $0x114] ss:$8 sps:$4 sm:$0xff]   ;;  %v1372_v27 = vld [vmem:[%s2041_s1 + $0x110] ss:$8 sps:$4 sm:$0xff]   ;;  %v1375_v29 = vld [vmem:[%s2041_s1 + $0x104] ss:$8 sps:$4 sm:$0xff]  }
   0xb   :  { %937 = vmatpush1.bf16.msra.mxu0 %v1347_v10  ;;  %v1377_v30 = vld [vmem:[%s2041_s1] ss:$8 sps:$4 sm:$0xff]   ;;  %v1379_v32 = vld [vmem:[%s2041_s1 + $0xf4] ss:$8 sps:$4 sm:$0xff]   ;;  %v1383_v34 = vld [vmem:[%s2041_s1 + $0xf0] ss:$8 sps:$4 sm:$0xff]  }
   0xc   :  { %980 = vmatpush1.bf16.msra.mxu1 %v1348_v11  ;;  %938 = vmatprep.subr.bf16.mxu0 %v1349_v12  ;;  %v1378_v31 = vld [vmem:[%s2041_s1 + $0x100] ss:$8 sps:$4 sm:$0xff]   ;;  %v1381_v33 = vld [vmem:[%s2041_s1 + $0x1f4] ss:$8 sps:$4 sm:$0xff]   ;;  %v1384_v35 = vld [vmem:[%s2041_s1 + $0x1f0] ss:$8 sps:$4 sm:$0xff]  }
   0xd   :  { %981 = vmatprep.subr.bf16.mxu1 %v1351_v13  ;;  %v1385_v36 = vld [vmem:[%s2041_s1 + $0xe4] ss:$8 sps:$4 sm:$0xff]   ;;  %v1389_v38 = vld [vmem:[%s2041_s1 + $0xe0] ss:$8 sps:$4 sm:$0xff]   ;;  %v1391_v40 = vld [vmem:[%s2041_s1 + $0xd4] ss:$8 sps:$4 sm:$0xff]  }
   0xe   :  { %v1387_v37 = vld [vmem:[%s2041_s1 + $0x1e4] ss:$8 sps:$4 sm:$0xff]   ;;  %v1390_v39 = vld [vmem:[%s2041_s1 + $0x1e0] ss:$8 sps:$4 sm:$0xff]   ;;  %v1393_v41 = vld [vmem:[%s2041_s1 + $0x1d4] ss:$8 sps:$4 sm:$0xff]  }
   0xf   :  { %939 = vmatpush1.bf16.msra.mxu0 %v1353_v14  ;;  %v1395_v42 = vld [vmem:[%s2041_s1 + $0xd0] ss:$8 sps:$4 sm:$0xff]   ;;  %v1397_v44 = vld [vmem:[%s2041_s1 + $0xc4] ss:$8 sps:$4 sm:$0xff]   ;;  %v1401_v46 = vld [vmem:[%s2041_s1 + $0xc0] ss:$8 sps:$4 sm:$0xff]  }
  0x10   :  { %982 = vmatpush1.bf16.msra.mxu1 %v1354_v15  ;;  %940 = vmatprep.subr.bf16.mxu0 %v1355_v16  ;;  %v1396_v43 = vld [vmem:[%s2041_s1 + $0x1d0] ss:$8 sps:$4 sm:$0xff]   ;;  %v1399_v45 = vld [vmem:[%s2041_s1 + $0x1c4] ss:$8 sps:$4 sm:$0xff]   ;;  %v1402_v47 = vld [vmem:[%s2041_s1 + $0x1c0] ss:$8 sps:$4 sm:$0xff]  }
  0x11   :  { %983 = vmatprep.subr.bf16.mxu1 %v1357_v17  ;;  %v1403_v48 = vld [vmem:[%s2041_s1 + $0xb4] ss:$8 sps:$4 sm:$0xff]   ;;  %v1429_v49 = vld [vmem:[%s2042_s0 + $0x4] ss:$36 sps:$4 sm:$0xff]   ;;  %v1432_v51 = vld [vmem:[%s2042_s0 + $0xc] ss:$36 sps:$4 sm:$0xff]  }
  0x12   :  { %v1405_v50 = vld [vmem:[%s2041_s1 + $0x1b4] ss:$8 sps:$4 sm:$0xff]   ;;  %964 = vmatprep.mubr.bf16.mxu0 %v1429_v49  ;;  %v1407_v52 = vld [vmem:[%s2041_s1 + $0xb0] ss:$8 sps:$4 sm:$0xff]   ;;  %1007 = vmatprep.mubr.bf16.mxu1 %v1432_v51  ;;  %v1409_v54 = vld [vmem:[%s2041_s1 + $0xa4] ss:$8 sps:$4 sm:$0xff]  }
  0x13   :  { %941 = vmatpush1.bf16.msra.mxu0 %v1359_v18  ;;  %v1408_v53 = vld [vmem:[%s2041_s1 + $0x1b0] ss:$8 sps:$4 sm:$0xff]   ;;  %v1411_v55 = vld [vmem:[%s2041_s1 + $0x1a4] ss:$8 sps:$4 sm:$0xff]   ;;  %v1413_v56 = vld [vmem:[%s2041_s1 + $0xa0] ss:$8 sps:$4 sm:$0xff]  }
  0x14   :  { %984 = vmatpush1.bf16.msra.mxu1 %v1360_v19  ;;  %942 = vmatprep.subr.bf16.mxu0 %v1361_v20  ;;  %v1414_v57 = vld [vmem:[%s2041_s1 + $0x1a0] ss:$8 sps:$4 sm:$0xff]   ;;  %v1415_v58 = vld [vmem:[%s2041_s1 + $0x94] ss:$8 sps:$4 sm:$0xff]   ;;  %v1419_v60 = vld [vmem:[%s2041_s1 + $0x90] ss:$8 sps:$4 sm:$0xff]  }
  0x15   :  { %985 = vmatprep.subr.bf16.mxu1 %v1363_v21  ;;  %v1417_v59 = vld [vmem:[%s2041_s1 + $0x194] ss:$8 sps:$4 sm:$0xff]   ;;  %v1420_v61 = vld [vmem:[%s2041_s1 + $0x190] ss:$8 sps:$4 sm:$0xff]   ;;  %v1421_v62 = vld [vmem:[%s2041_s1 + $0x84] ss:$8 sps:$4 sm:$0xff]  }
  0x16   :  { %v1423_v63 = vld [vmem:[%s2041_s1 + $0x184] ss:$8 sps:$4 sm:$0xff]   ;;  %v1425_v0 = vld [vmem:[%s2041_s1 + $0x80] ss:$8 sps:$4 sm:$0xff]   ;;  %v1435_v2 = vld [vmem:[%s2041_s1 + $0x274] ss:$8 sps:$4 sm:$0xff]  }
  0x17   :  { %943 = vmatpush1.bf16.msra.mxu0 %v1365_v22  ;;  %v1426_v1 = vld [vmem:[%s2041_s1 + $0x180] ss:$8 sps:$4 sm:$0xff]   ;;  %v1438_v3 = vld [vmem:[%s2041_s1 + $0x374] ss:$8 sps:$4 sm:$0xff]   ;;  %v1433_v6 = vld [vmem:[%s2041_s1 + $0x270] ss:$8 sps:$4 sm:$0xff]  }
  0x18   :  { %986 = vmatpush1.bf16.msra.mxu1 %v1366_v23  ;;  %944 = vmatprep.subr.bf16.mxu0 %v1367_v24  ;;  %v1427_v4 = vld [vmem:[%s2042_s0] ss:$36 sps:$4 sm:$0xff]   ;;  %v1430_v5 = vld [vmem:[%s2042_s0 + $0x8] ss:$36 sps:$4 sm:$0xff]   ;;  %v1436_v7 = vld [vmem:[%s2041_s1 + $0x370] ss:$8 sps:$4 sm:$0xff]  }
  0x19   :  { %987 = vmatprep.subr.bf16.mxu1 %v1369_v25  ;;  %v1441_v8 = vld [vmem:[%s2041_s1 + $0x264] ss:$8 sps:$4 sm:$0xff]   ;;  %v1439_v10 = vld [vmem:[%s2041_s1 + $0x260] ss:$8 sps:$4 sm:$0xff]   ;;  %v1447_v12 = vld [vmem:[%s2041_s1 + $0x254] ss:$8 sps:$4 sm:$0xff]  }
  0x1a   :  { %v1444_v9 = vld [vmem:[%s2041_s1 + $0x364] ss:$8 sps:$4 sm:$0xff]   ;;  %v1442_v11 = vld [vmem:[%s2041_s1 + $0x360] ss:$8 sps:$4 sm:$0xff]   ;;  %v1450_v13 = vld [vmem:[%s2041_s1 + $0x354] ss:$8 sps:$4 sm:$0xff]  }
  0x1b   :  { %945 = vmatpush1.bf16.msra.mxu0 %v1371_v26  ;;  %v1445_v14 = vld [vmem:[%s2041_s1 + $0x250] ss:$8 sps:$4 sm:$0xff]   ;;  %v1453_v16 = vld [vmem:[%s2041_s1 + $0x244] ss:$8 sps:$4 sm:$0xff]   ;;  %v1451_v18 = vld [vmem:[%s2041_s1 + $0x240] ss:$8 sps:$4 sm:$0xff]  }
  0x1c   :  { %988 = vmatpush1.bf16.msra.mxu1 %v1372_v27  ;;  %946 = vmatprep.subr.bf16.mxu0 %v1373_v28  ;;  %v1448_v15 = vld [vmem:[%s2041_s1 + $0x350] ss:$8 sps:$4 sm:$0xff]   ;;  %v1456_v17 = vld [vmem:[%s2041_s1 + $0x344] ss:$8 sps:$4 sm:$0xff]   ;;  %v1454_v19 = vld [vmem:[%s2041_s1 + $0x340] ss:$8 sps:$4 sm:$0xff]  }
  0x1d   :  { %989 = vmatprep.subr.bf16.mxu1 %v1375_v29  ;;  %v1459_v20 = vld [vmem:[%s2041_s1 + $0x234] ss:$8 sps:$4 sm:$0xff]   ;;  %v1457_v22 = vld [vmem:[%s2041_s1 + $0x230] ss:$8 sps:$4 sm:$0xff]   ;;  %v1465_v24 = vld [vmem:[%s2041_s1 + $0x224] ss:$8 sps:$4 sm:$0xff]  }
  0x1e   :  { %v1462_v21 = vld [vmem:[%s2041_s1 + $0x334] ss:$8 sps:$4 sm:$0xff]   ;;  %v1460_v23 = vld [vmem:[%s2041_s1 + $0x330] ss:$8 sps:$4 sm:$0xff]   ;;  %v1468_v25 = vld [vmem:[%s2041_s1 + $0x324] ss:$8 sps:$4 sm:$0xff]  }
  0x1f   :  { %947 = vmatpush1.bf16.msra.mxu0 %v1377_v30  ;;  %v1463_v26 = vld [vmem:[%s2041_s1 + $0x220] ss:$8 sps:$4 sm:$0xff]   ;;  %v1471_v28 = vld [vmem:[%s2041_s1 + $0x214] ss:$8 sps:$4 sm:$0xff]   ;;  %v1469_v30 = vld [vmem:[%s2041_s1 + $0x210] ss:$8 sps:$4 sm:$0xff]  }
  0x20   :  { %990 = vmatpush1.bf16.msra.mxu1 %v1378_v31  ;;  %948 = vmatprep.subr.bf16.mxu0 %v1379_v32  ;;  %v1466_v27 = vld [vmem:[%s2041_s1 + $0x320] ss:$8 sps:$4 sm:$0xff]   ;;  %v1474_v29 = vld [vmem:[%s2041_s1 + $0x314] ss:$8 sps:$4 sm:$0xff]   ;;  %v1472_v31 = vld [vmem:[%s2041_s1 + $0x310] ss:$8 sps:$4 sm:$0xff]  }
  0x21   :  { %991 = vmatprep.subr.bf16.mxu1 %v1381_v33  ;;  %v1477_v32 = vld [vmem:[%s2041_s1 + $0x204] ss:$8 sps:$4 sm:$0xff]   ;;  %v1496_v49 = vld [vmem:[%s2041_s1 + $0x3d0] ss:$8 sps:$4 sm:$0xff]  }
  0x22   :  { %v1480_v33 = vld [vmem:[%s2041_s1 + $0x304] ss:$8 sps:$4 sm:$0xff]  }
  0x23   :  { %949 = vmatpush2.bf16.msra.mxu0 %v1383_v34  ;;  %v1531_v34 = vld [vmem:[%s2042_s0 + $0x14] ss:$36 sps:$4 sm:$0xff]   ;;  %v1504_v51 = vld [vmem:[%s2041_s1 + $0x3c4] ss:$8 sps:$4 sm:$0xff]  }
  0x24   :  { %992 = vmatpush2.bf16.msra.mxu1 %v1384_v35  ;;  %950 = vmatprep.subr.bf16.mxu0 %v1385_v36  ;;  %v1475_v35 = vld [vmem:[%s2041_s1 + $0x200] ss:$8 sps:$4 sm:$0xff]  }
  0x25   :  { %993 = vmatprep.subr.bf16.mxu1 %v1387_v37  ;;  %v1478_v36 = vld [vmem:[%s2041_s1 + $0x300] ss:$8 sps:$4 sm:$0xff]  }
  0x26   :  { %v1537_v37 = vld [vmem:[%s2042_s0 + $0x1c] ss:$36 sps:$4 sm:$0xff]  }
  0x27   :  { %951 = vmatpush2.bf16.msra.mxu0 %v1389_v38  ;;  %v1483_v38 = vld [vmem:[%s2041_s1 + $0x2f4] ss:$8 sps:$4 sm:$0xff]  }
  0x28   :  { %994 = vmatpush2.bf16.msra.mxu1 %v1390_v39  ;;  %952 = vmatprep.subr.bf16.mxu0 %v1391_v40  ;;  %v1486_v39 = vld [vmem:[%s2041_s1 + $0x3f4] ss:$8 sps:$4 sm:$0xff]   ;;  %v1481_v40 = vld [vmem:[%s2041_s1 + $0x2f0] ss:$8 sps:$4 sm:$0xff]  }
  0x29   :  { %995 = vmatprep.subr.bf16.mxu1 %v1393_v41  ;;  %v1484_v41 = vld [vmem:[%s2041_s1 + $0x3f0] ss:$8 sps:$4 sm:$0xff]  }
  0x2b   :  { %953 = vmatpush2.bf16.msra.mxu0 %v1395_v42  ;;  %v1489_v42 = vld [vmem:[%s2041_s1 + $0x2e4] ss:$8 sps:$4 sm:$0xff]  }
  0x2c   :  { %996 = vmatpush2.bf16.msra.mxu1 %v1396_v43  ;;  %954 = vmatprep.subr.bf16.mxu0 %v1397_v44  ;;  %v1492_v43 = vld [vmem:[%s2041_s1 + $0x3e4] ss:$8 sps:$4 sm:$0xff]   ;;  %v1487_v44 = vld [vmem:[%s2041_s1 + $0x2e0] ss:$8 sps:$4 sm:$0xff]  }
  0x2d   :  { %997 = vmatprep.subr.bf16.mxu1 %v1399_v45  ;;  %v1490_v45 = vld [vmem:[%s2041_s1 + $0x3e0] ss:$8 sps:$4 sm:$0xff]  }
  0x2f   :  { %955 = vmatpush2.bf16.msra.mxu0 %v1401_v46  ;;  %v1495_v46 = vld [vmem:[%s2041_s1 + $0x2d4] ss:$8 sps:$4 sm:$0xff]  }
  0x30   :  { %998 = vmatpush2.bf16.msra.mxu1 %v1402_v47  ;;  %956 = vmatprep.subr.bf16.mxu0 %v1403_v48  ;;  %v1498_v47 = vld [vmem:[%s2041_s1 + $0x3d4] ss:$8 sps:$4 sm:$0xff]   ;;  %v1493_v48 = vld [vmem:[%s2041_s1 + $0x2d0] ss:$8 sps:$4 sm:$0xff]  }
  0x31   :  { %999 = vmatprep.subr.bf16.mxu1 %v1405_v50  ;;  %v1501_v50 = vld [vmem:[%s2041_s1 + $0x2c4] ss:$8 sps:$4 sm:$0xff]  }
  0x33   :  { %957 = vmatpush2.bf16.msra.mxu0 %v1407_v52  ;;  %v1499_v52 = vld [vmem:[%s2041_s1 + $0x2c0] ss:$8 sps:$4 sm:$0xff]  }
  0x34   :  { %1000 = vmatpush2.bf16.msra.mxu1 %v1408_v53  ;;  %958 = vmatprep.subr.bf16.mxu0 %v1409_v54  ;;  %v1502_v53 = vld [vmem:[%s2041_s1 + $0x3c0] ss:$8 sps:$4 sm:$0xff]   ;;  %v1507_v54 = vld [vmem:[%s2041_s1 + $0x2b4] ss:$8 sps:$4 sm:$0xff]  }
  0x35   :  { %1001 = vmatprep.subr.bf16.mxu1 %v1411_v55  ;;  %v1510_v55 = vld [vmem:[%s2041_s1 + $0x3b4] ss:$8 sps:$4 sm:$0xff]  }
  0x37   :  { %959 = vmatpush2.bf16.msra.mxu0 %v1413_v56  ;;  %v1505_v56 = vld [vmem:[%s2041_s1 + $0x2b0] ss:$8 sps:$4 sm:$0xff]  }
  0x38   :  { %1002 = vmatpush2.bf16.msra.mxu1 %v1414_v57  ;;  %960 = vmatprep.subr.bf16.mxu0 %v1415_v58  ;;  %v1508_v57 = vld [vmem:[%s2041_s1 + $0x3b0] ss:$8 sps:$4 sm:$0xff]   ;;  %v1513_v58 = vld [vmem:[%s2041_s1 + $0x2a4] ss:$8 sps:$4 sm:$0xff]  }
  0x39   :  { %1003 = vmatprep.subr.bf16.mxu1 %v1417_v59  ;;  %v1516_v59 = vld [vmem:[%s2041_s1 + $0x3a4] ss:$8 sps:$4 sm:$0xff]  }
  0x3b   :  { %961 = vmatpush2.bf16.msra.mxu0 %v1419_v60  ;;  %v1511_v60 = vld [vmem:[%s2041_s1 + $0x2a0] ss:$8 sps:$4 sm:$0xff]  }
  0x3c   :  { %1004 = vmatpush2.bf16.msra.mxu1 %v1420_v61  ;;  %962 = vmatprep.subr.bf16.mxu0 %v1421_v62  ;;  %v1514_v61 = vld [vmem:[%s2041_s1 + $0x3a0] ss:$8 sps:$4 sm:$0xff]   ;;  %v1519_v62 = vld [vmem:[%s2041_s1 + $0x294] ss:$8 sps:$4 sm:$0xff]  }
  0x3d   :  { %1005 = vmatprep.subr.bf16.mxu1 %v1423_v63  ;;  %v1522_v63 = vld [vmem:[%s2041_s1 + $0x394] ss:$8 sps:$4 sm:$0xff]  }
  0x3f   :  { %963 = vmatpush2.bf16.msra.mxu0 %v1425_v0  ;;  %v1517_v0 = vld [vmem:[%s2041_s1 + $0x290] ss:$8 sps:$4 sm:$0xff]  }
  0x40   :  { %1006 = vmatpush2.bf16.msra.mxu1 %v1426_v1  ;;  %1018 = vmatprep.subr.bf16.mxu0 %v1435_v2  ;;  %v1520_v1 = vld [vmem:[%s2041_s1 + $0x390] ss:$8 sps:$4 sm:$0xff]   ;;  %v1525_v2 = vld [vmem:[%s2041_s1 + $0x284] ss:$8 sps:$4 sm:$0xff]  }
  0x41   :  { %1061 = vmatprep.subr.bf16.mxu1 %v1438_v3  ;;  %v1528_v3 = vld [vmem:[%s2041_s1 + $0x384] ss:$8 sps:$4 sm:$0xff]  }
  0x42   :  { %965 = vmatmul.mubr.bf16.vlgmr.msra.gmra.mxu0 %v1427_v4  ;;  %v1523_v4 = vld [vmem:[%s2041_s1 + $0x280] ss:$8 sps:$4 sm:$0xff]  }
  0x43   :  { %1008 = vmatmul.mubr.bf16.vlgmr.msra.gmra.mxu1 %v1430_v5  ;;  %1019 = vmatpush1.bf16.msra.mxu0 %v1433_v6  ;;  %v1526_v5 = vld [vmem:[%s2041_s1 + $0x380] ss:$8 sps:$4 sm:$0xff]   ;;  %v1534_v6 = vld [vmem:[%s2041_s1 + $0x474] ss:$8 sps:$4 sm:$0xff]  }
  0x44   :  { %1062 = vmatpush1.bf16.msra.mxu1 %v1436_v7  ;;  %1020 = vmatprep.subr.bf16.mxu0 %v1441_v8  ;;  %v1529_v7 = vld [vmem:[%s2042_s0 + $0x10] ss:$36 sps:$4 sm:$0xff]   ;;  %v1535_v8 = vld [vmem:[%s2042_s0 + $0x18] ss:$36 sps:$4 sm:$0xff]  }
  0x45   :  { %1063 = vmatprep.subr.bf16.mxu1 %v1444_v9  ;;  %1050 = vmatprep.mubr.bf16.mxu0 %v1531_v34  ;;  %v1532_v9 = vld [vmem:[%s2041_s1 + $0x470] ss:$8 sps:$4 sm:$0xff]  }
  0x46   :  { %1093 = vmatprep.mubr.bf16.mxu1 %v1537_v37 }
  0x47   :  { %1021 = vmatpush1.bf16.msra.mxu0 %v1439_v10  ;;  %v1540_v10 = vld [vmem:[%s2041_s1 + $0x464] ss:$8 sps:$4 sm:$0xff]  }
  0x48   :  { %1064 = vmatpush1.bf16.msra.mxu1 %v1442_v11  ;;  %1022 = vmatprep.subr.bf16.mxu0 %v1447_v12  ;;  %v1538_v11 = vld [vmem:[%s2041_s1 + $0x460] ss:$8 sps:$4 sm:$0xff]   ;;  %v1560_v12 = vmov 0  }
  0x49   :  { %1065 = vmatprep.subr.bf16.mxu1 %v1450_v13  ;;  %v1543_v13 = vld [vmem:[%s2041_s1 + $0x454] ss:$8 sps:$4 sm:$0xff]  }
  0x4b   :  { %1023 = vmatpush1.bf16.msra.mxu0 %v1445_v14  ;;  %v1541_v14 = vld [vmem:[%s2041_s1 + $0x450] ss:$8 sps:$4 sm:$0xff]  }
  0x4c   :  { %1066 = vmatpush1.bf16.msra.mxu1 %v1448_v15  ;;  %1024 = vmatprep.subr.bf16.mxu0 %v1453_v16  ;;  %v1546_v15 = vld [vmem:[%s2041_s1 + $0x444] ss:$8 sps:$4 sm:$0xff]   ;;  %v1544_v16 = vld [vmem:[%s2041_s1 + $0x440] ss:$8 sps:$4 sm:$0xff]  }
  0x4d   :  { %1067 = vmatprep.subr.bf16.mxu1 %v1456_v17  ;;  %v1549_v17 = vld [vmem:[%s2041_s1 + $0x434] ss:$8 sps:$4 sm:$0xff]  }
  0x4f   :  { %1025 = vmatpush1.bf16.msra.mxu0 %v1451_v18  ;;  %v1547_v18 = vld [vmem:[%s2041_s1 + $0x430] ss:$8 sps:$4 sm:$0xff]  }
  0x50   :  { %1068 = vmatpush1.bf16.msra.mxu1 %v1454_v19  ;;  %1026 = vmatprep.subr.bf16.mxu0 %v1459_v20  ;;  %v1552_v19 = vld [vmem:[%s2041_s1 + $0x424] ss:$8 sps:$4 sm:$0xff]   ;;  %v1550_v20 = vld [vmem:[%s2041_s1 + $0x420] ss:$8 sps:$4 sm:$0xff]  }
  0x51   :  { %1069 = vmatprep.subr.bf16.mxu1 %v1462_v21  ;;  %v1555_v21 = vld [vmem:[%s2041_s1 + $0x414] ss:$8 sps:$4 sm:$0xff]  }
  0x53   :  { %1027 = vmatpush1.bf16.msra.mxu0 %v1457_v22  ;;  %v1553_v22 = vld [vmem:[%s2041_s1 + $0x410] ss:$8 sps:$4 sm:$0xff]  }
  0x54   :  { %1070 = vmatpush1.bf16.msra.mxu1 %v1460_v23  ;;  %1028 = vmatprep.subr.bf16.mxu0 %v1465_v24  ;;  %v1558_v23 = vld [vmem:[%s2041_s1 + $0x404] ss:$8 sps:$4 sm:$0xff]   ;;  %v1556_v24 = vld [vmem:[%s2041_s1 + $0x400] ss:$8 sps:$4 sm:$0xff]  }
  0x55   :  { %1071 = vmatprep.subr.bf16.mxu1 %v1468_v25  ;;  %v1559_v25 = vld [vmem:[%s2042_s0 + $0x20] ss:$36 sps:$4 sm:$0xff]  }
  0x57   :  { %1029 = vmatpush1.bf16.msra.mxu0 %v1463_v26 }
  0x58   :  { %1072 = vmatpush1.bf16.msra.mxu1 %v1466_v27  ;;  %1030 = vmatprep.subr.bf16.mxu0 %v1471_v28 }
  0x59   :  { %1073 = vmatprep.subr.bf16.mxu1 %v1474_v29 }
  0x5b   :  { %1031 = vmatpush1.bf16.msra.mxu0 %v1469_v30 }
  0x5c   :  { %1074 = vmatpush1.bf16.msra.mxu1 %v1472_v31  ;;  %1032 = vmatprep.subr.bf16.mxu0 %v1477_v32 }
  0x5d   :  { %1075 = vmatprep.subr.bf16.mxu1 %v1480_v33 }
  0x5f   :  { %1033 = vmatpush1.bf16.msra.mxu0 %v1475_v35 }
  0x60   :  { %1076 = vmatpush1.bf16.msra.mxu1 %v1478_v36  ;;  %1034 = vmatprep.subr.bf16.mxu0 %v1483_v38 }
  0x61   :  { %1077 = vmatprep.subr.bf16.mxu1 %v1486_v39 }
  0x63   :  { %1035 = vmatpush2.bf16.msra.mxu0 %v1481_v40 }
  0x64   :  { %1078 = vmatpush2.bf16.msra.mxu1 %v1484_v41  ;;  %1036 = vmatprep.subr.bf16.mxu0 %v1489_v42 }
  0x65   :  { %1079 = vmatprep.subr.bf16.mxu1 %v1492_v43 }
  0x67   :  { %1037 = vmatpush2.bf16.msra.mxu0 %v1487_v44 }
  0x68   :  { %1080 = vmatpush2.bf16.msra.mxu1 %v1490_v45  ;;  %1038 = vmatprep.subr.bf16.mxu0 %v1495_v46 }
  0x69   :  { %1081 = vmatprep.subr.bf16.mxu1 %v1498_v47 }
  0x6b   :  { %1039 = vmatpush2.bf16.msra.mxu0 %v1493_v48 }
  0x6c   :  { %1082 = vmatpush2.bf16.msra.mxu1 %v1496_v49  ;;  %1040 = vmatprep.subr.bf16.mxu0 %v1501_v50 }
  0x6d   :  { %1083 = vmatprep.subr.bf16.mxu1 %v1504_v51 }
  0x6f   :  { %1041 = vmatpush2.bf16.msra.mxu0 %v1499_v52 }
  0x70   :  { %1084 = vmatpush2.bf16.msra.mxu1 %v1502_v53  ;;  %1042 = vmatprep.subr.bf16.mxu0 %v1507_v54 }
  0x71   :  { %1085 = vmatprep.subr.bf16.mxu1 %v1510_v55 }
  0x73   :  { %1043 = vmatpush2.bf16.msra.mxu0 %v1505_v56 }
  0x74   :  { %1086 = vmatpush2.bf16.msra.mxu1 %v1508_v57  ;;  %1044 = vmatprep.subr.bf16.mxu0 %v1513_v58 }
  0x75   :  { %1087 = vmatprep.subr.bf16.mxu1 %v1516_v59 }
  0x77   :  { %1045 = vmatpush2.bf16.msra.mxu0 %v1511_v60 }
  0x78   :  { %1088 = vmatpush2.bf16.msra.mxu1 %v1514_v61  ;;  %1046 = vmatprep.subr.bf16.mxu0 %v1519_v62 }
  0x79   :  { %1089 = vmatprep.subr.bf16.mxu1 %v1522_v63 }
  0x7b   :  { %1047 = vmatpush2.bf16.msra.mxu0 %v1517_v0 }
  0x7c   :  { %1090 = vmatpush2.bf16.msra.mxu1 %v1520_v1  ;;  %1048 = vmatprep.subr.bf16.mxu0 %v1525_v2 }
  0x7d   :  { %1091 = vmatprep.subr.bf16.mxu1 %v1528_v3 }
  0x7f   :  { %1049 = vmatpush2.bf16.msra.mxu0 %v1523_v4 }
  0x80   :  { %1092 = vmatpush2.bf16.msra.mxu1 %v1526_v5  ;;  %1104 = vmatprep.subr.bf16.mxu0 %v1534_v6 }
  0x82   :  { %1051 = vmatmul.mubr.bf16.vlgmr.msra.gmra.mxu0 %v1529_v7 }
  0x83   :  { %1094 = vmatmul.mubr.bf16.vlgmr.msra.gmra.mxu1 %v1535_v8  ;;  %1105 = vmatpush1.bf16.msra.mxu0 %v1532_v9 }
  0x84   :  { %1136 = vmatprep.mubr.bf16.mxu0 %v1560_v12  ;;  %1106 = vmatprep.subr.bf16.mxu0 %v1540_v10 }
  0x87   :  { %1107 = vmatpush1.bf16.msra.mxu0 %v1538_v11 }
  0x88   :  { %1108 = vmatprep.subr.bf16.mxu0 %v1543_v13 }
  0x8b   :  { %1109 = vmatpush1.bf16.msra.mxu0 %v1541_v14 }
  0x8c   :  { %1110 = vmatprep.subr.bf16.mxu0 %v1546_v15 }
  0x8f   :  { %1111 = vmatpush1.bf16.msra.mxu0 %v1544_v16 }
  0x90   :  { %1112 = vmatprep.subr.bf16.mxu0 %v1549_v17 }
  0x93   :  { %1113 = vmatpush1.bf16.msra.mxu0 %v1547_v18 }
  0x94   :  { %1114 = vmatprep.subr.bf16.mxu0 %v1552_v19 }
  0x97   :  { %1115 = vmatpush1.bf16.msra.mxu0 %v1550_v20 }
  0x98   :  { %1116 = vmatprep.subr.bf16.mxu0 %v1555_v21 }
  0x9b   :  { %1117 = vmatpush1.bf16.msra.mxu0 %v1553_v22 }
  0x9c   :  { %1118 = vmatprep.subr.bf16.mxu0 %v1558_v23 }
  0x9f   :  { %1119 = vmatpush1.bf16.msra.mxu0 %v1556_v24 }
  0xa2   :  { %1137 = vmatmul.mubr.bf16.vlgmr.msra.gmra.mxu0 %v1559_v25 }
 0x102   :  { %v966_v26 = vpop.f32.mrf.mxu0 }
 0x103   :  { %v1009_v27 = vpop.f32.mrf.mxu1 }
 0x104   :  { %v968_v28 = vpop.f32.mrf.mxu0  ;;  %v1010_v37 = vadd.f32 %v1009_v27, %v966_v26 }
 0x105   :  { %v1011_v29 = vpop.f32.mrf.mxu1 }
 0x106   :  { %v970_v30 = vpop.f32.mrf.mxu0  ;;  %v1012_v40 = vadd.f32 %v1011_v29, %v968_v28 }
 0x107   :  { %v1013_v31 = vpop.f32.mrf.mxu1 }
 0x108   :  { %v972_v32 = vpop.f32.mrf.mxu0  ;;  %v1014_v42 = vadd.f32 %v1013_v31, %v970_v30 }
 0x109   :  { %v1015_v34 = vpop.f32.mrf.mxu1 }
 0x10a   :  { %v1016_v46 = vadd.f32 %v1015_v34, %v972_v32 }
 0x142   :  { %v1052_v33 = vpop.f32.mrf.mxu0 }
 0x143   :  { %v1095_v36 = vpop.f32.mrf.mxu1  ;;  %v1053_v41 = vadd.f32 %v1052_v33, %v1010_v37 }
 0x144   :  { %v1054_v35 = vpop.f32.mrf.mxu0 }
 0x145   :  { %v1097_v39 = vpop.f32.mrf.mxu1  ;;  %v1055_v43 = vadd.f32 %v1054_v35, %v1012_v40  ;;  %v1096_v47 = vadd.f32 %v1095_v36, %v1053_v41 }
 0x146   :  { %v1056_v38 = vpop.f32.mrf.mxu0 }
 0x147   :  { %v1099_v45 = vpop.f32.mrf.mxu1  ;;  %v1057_v48 = vadd.f32 %v1056_v38, %v1014_v42  ;;  %v1098_v50 = vadd.f32 %v1097_v39, %v1055_v43 }
 0x148   :  { %v1058_v44 = vpop.f32.mrf.mxu0 }
 0x149   :  { %v1059_v51 = vadd.f32 %v1058_v44, %v1016_v46  ;;  %v1101_v53 = vpop.f32.mrf.mxu1  ;;  %v1100_v55 = vadd.f32 %v1099_v45, %v1057_v48 }
 0x14b   :  { %v1102_v59 = vadd.f32 %v1101_v53, %v1059_v51 }
 0x162   :  { %v1138_v49 = vpop.f32.mrf.mxu0 }
 0x163   :  { %v1139_v52 = vadd.f32 %v1138_v49, %v1096_v47 }
 0x164   :  { %v1140_v54 = vpop.f32.mrf.mxu0 }
 0x165   :  { %v1147_v56 = vmul.f32 0.2, %v1139_v52  ;;  %v1141_v57 = vadd.f32 %v1140_v54, %v1098_v50 }
 0x166   :  { %v1142_v58 = vpop.f32.mrf.mxu0 }
 0x167   :  { %v1148_v60 = vmul.f32 0.2, %v1141_v57  ;;  %v1143_v61 = vadd.f32 %v1142_v58, %v1100_v55  ;;  %v1151_v63 = vmax.f32 %v1139_v52, %v1147_v56 }
 0x168   :  { %v1144_v62 = vpop.f32.mrf.mxu0 }
 0x169   :  { %v1152_v0 = vmax.f32 %v1141_v57, %v1148_v60  ;;  %v1149_v1 = vmul.f32 0.2, %v1143_v61  ;;  %v1145_v2 = vadd.f32 %v1144_v62, %v1102_v59 }
 0x16b   :  { %v1328_v3 = vpack.c.bf16 %v1152_v0, %v1151_v63  ;;  %v1150_v4 = vmul.f32 0.2, %v1145_v2  ;;  %v1153_v5 = vmax.f32 %v1143_v61, %v1149_v1 }
 0x16d   :  { %1167 = vst [vmem:[%s2043_s2] sm:$0xff] %v1328_v3  ;;  %v1154_v6 = vmax.f32 %v1145_v2, %v1150_v4 }
 0x16f   :  { %v1329_v7 = vpack.c.bf16 %v1154_v6, %v1153_v5 }
 0x171   :  { %1168 = vst [vmem:[%s2043_s2 + $0x8] sm:$0xff] %v1329_v7 }

// kernel: mnist_disc_forward.9
= control target key start
LH: loop header
LB: loop body
LE: loop exit
PB: predicated region body
PF: predicated region fallthrough
CT: control target
= control target key end

     0   :  { %s1225_s1 = inlined_call_operand.vmem [shape: bf16[1024,128], index: 1, kind: input, shape index: {}]   ;;  %s1226_s0 = inlined_call_operand.vmem [shape: bf16[16,1024], index: 0, kind: input, shape index: {}]   ;;  %s1227_s2 = inlined_call_operand.vmem [shape: f32[16,128], index: 2, kind: output, shape index: {}]  }
   0x1   :  { %v916_v0 = vld [vmem:[%s1225_s1 + $0x78] sm:$0xff]   ;;  %v920_v4 = vld [vmem:[%s1225_s1 + $0x70] sm:$0xff]   ;;  %v924_v8 = vld [vmem:[%s1225_s1 + $0x68] sm:$0xff]  }
   0x2   :  { %v917_v1 = vld [vmem:[%s1225_s1 + $0xf8] sm:$0xff]   ;;  %828 = vmatprep.subr.bf16.mxu0 %v916_v0  ;;  %v921_v5 = vld [vmem:[%s1225_s1 + $0xf0] sm:$0xff]   ;;  %v925_v9 = vld [vmem:[%s1225_s1 + $0xe8] sm:$0xff]  }
   0x3   :  { %v918_v2 = vld [vmem:[%s1225_s1 + $0x38] sm:$0xff]   ;;  %850 = vmatprep.subr.bf16.mxu1 %v917_v1  ;;  %v922_v6 = vld [vmem:[%s1225_s1 + $0x30] sm:$0xff]   ;;  %v926_v10 = vld [vmem:[%s1225_s1 + $0x28] sm:$0xff]  }
   0x4   :  { %v919_v3 = vld [vmem:[%s1225_s1 + $0xb8] sm:$0xff]   ;;  %829 = vmatpush3.bf16.msra.mxu0 %v918_v2  ;;  %v923_v7 = vld [vmem:[%s1225_s1 + $0xb0] sm:$0xff]   ;;  %v927_v11 = vld [vmem:[%s1225_s1 + $0xa8] sm:$0xff]  }
   0x5   :  { %851 = vmatpush3.bf16.msra.mxu1 %v919_v3  ;;  %830 = vmatprep.subr.bf16.mxu0 %v920_v4  ;;  %v928_v12 = vld [vmem:[%s1225_s1 + $0x60] sm:$0xff]   ;;  %v932_v16 = vld [vmem:[%s1225_s1 + $0x58] sm:$0xff]   ;;  %v936_v20 = vld [vmem:[%s1225_s1 + $0x50] sm:$0xff]  }
   0x6   :  { %852 = vmatprep.subr.bf16.mxu1 %v921_v5  ;;  %v929_v13 = vld [vmem:[%s1225_s1 + $0xe0] sm:$0xff]   ;;  %v933_v17 = vld [vmem:[%s1225_s1 + $0xd8] sm:$0xff]   ;;  %v937_v21 = vld [vmem:[%s1225_s1 + $0xd0] sm:$0xff]  }
   0x7   :  { %v930_v14 = vld [vmem:[%s1225_s1 + $0x20] sm:$0xff]   ;;  %v934_v18 = vld [vmem:[%s1225_s1 + $0x18] sm:$0xff]   ;;  %v938_v22 = vld [vmem:[%s1225_s1 + $0x10] sm:$0xff]  }
   0x8   :  { %831 = vmatpush3.bf16.msra.mxu0 %v922_v6  ;;  %v931_v15 = vld [vmem:[%s1225_s1 + $0xa0] sm:$0xff]   ;;  %v935_v19 = vld [vmem:[%s1225_s1 + $0x98] sm:$0xff]   ;;  %v939_v23 = vld [vmem:[%s1225_s1 + $0x90] sm:$0xff]  }
   0x9   :  { %853 = vmatpush3.bf16.msra.mxu1 %v923_v7  ;;  %832 = vmatprep.subr.bf16.mxu0 %v924_v8  ;;  %v940_v24 = vld [vmem:[%s1225_s1 + $0x48] sm:$0xff]   ;;  %v944_v28 = vld [vmem:[%s1225_s1 + $0x40] sm:$0xff]   ;;  %v948_v40 = vld [vmem:[%s1225_s1 + $0x178] sm:$0xff]  }
   0xa   :  { %854 = vmatprep.subr.bf16.mxu1 %v925_v9  ;;  %v941_v25 = vld [vmem:[%s1225_s1 + $0xc8] sm:$0xff]   ;;  %v945_v29 = vld [vmem:[%s1225_s1 + $0xc0] sm:$0xff]   ;;  %v949_v41 = vld [vmem:[%s1225_s1 + $0x1f8] sm:$0xff]  }
   0xb   :  { %v942_v26 = vld [vmem:[%s1225_s1 + $0x8] sm:$0xff]   ;;  %v946_v30 = vld [vmem:[%s1225_s1] sm:$0xff]   ;;  %v950_v42 = vld [vmem:[%s1225_s1 + $0x138] sm:$0xff]  }
   0xc   :  { %833 = vmatpush3.bf16.msra.mxu0 %v926_v10  ;;  %v943_v27 = vld [vmem:[%s1225_s1 + $0x88] sm:$0xff]   ;;  %v947_v31 = vld [vmem:[%s1225_s1 + $0x80] sm:$0xff]   ;;  %v951_v43 = vld [vmem:[%s1225_s1 + $0x1b8] sm:$0xff]  }
   0xd   :  { %855 = vmatpush3.bf16.msra.mxu1 %v927_v11  ;;  %834 = vmatprep.subr.bf16.mxu0 %v928_v12  ;;  %v12_v32 = vld [vmem:[%s1226_s0] sm:$0xff]  ;;  %v13_v34 = vld [vmem:[%s1226_s0 + $0x8] sm:$0xff]  ;;  %v952_v44 = vld [vmem:[%s1225_s1 + $0x170] sm:$0xff]  }
   0xe   :  { %856 = vmatprep.subr.bf16.mxu1 %v929_v13  ;;  %v16_v33 = vld [vmem:[%s1226_s0 + $0x20] sm:$0xff]  ;;  %v17_v37 = vld [vmem:[%s1226_s0 + $0x28] sm:$0xff]  ;;  %v953_v45 = vld [vmem:[%s1225_s1 + $0x1f0] sm:$0xff]  }
   0xf   :  { %v756_v35 = vcombine.low %v12_v32, %v16_v33  ;;  %v757_v36 = vcombine.high %v12_v32, %v16_v33  ;;  %v758_v38 = vcombine.low %v13_v34, %v17_v37  ;;  %v759_v39 = vcombine.high %v13_v34, %v17_v37  ;;  %v954_v46 = vld [vmem:[%s1225_s1 + $0x130] sm:$0xff]   ;;  %v956_v48 = vld [vmem:[%s1225_s1 + $0x168] sm:$0xff]   ;;  %v960_v52 = vld [vmem:[%s1225_s1 + $0x160] sm:$0xff]  }
  0x10   :  { %835 = vmatpush3.bf16.msra.mxu0 %v930_v14  ;;  %v955_v47 = vld [vmem:[%s1225_s1 + $0x1b0] sm:$0xff]   ;;  %v957_v49 = vld [vmem:[%s1225_s1 + $0x1e8] sm:$0xff]   ;;  %v961_v53 = vld [vmem:[%s1225_s1 + $0x1e0] sm:$0xff]  }
  0x11   :  { %857 = vmatpush3.bf16.msra.mxu1 %v931_v15  ;;  %836 = vmatprep.subr.bf16.mxu0 %v932_v16  ;;  %v958_v50 = vld [vmem:[%s1225_s1 + $0x128] sm:$0xff]   ;;  %v962_v54 = vld [vmem:[%s1225_s1 + $0x120] sm:$0xff]   ;;  %v964_v56 = vld [vmem:[%s1225_s1 + $0x158] sm:$0xff]  }
  0x12   :  { %858 = vmatprep.subr.bf16.mxu1 %v933_v17  ;;  %604 = vmatprep.mubr.bf16.mxu0 %v757_v36  ;;  %v959_v51 = vld [vmem:[%s1225_s1 + $0x1a8] sm:$0xff]   ;;  %v963_v55 = vld [vmem:[%s1225_s1 + $0x1a0] sm:$0xff]   ;;  %v965_v57 = vld [vmem:[%s1225_s1 + $0x1d8] sm:$0xff]  }
  0x13   :  { %645 = vmatprep.mubr.bf16.mxu1 %v759_v39  ;;  %v966_v58 = vld [vmem:[%s1225_s1 + $0x118] sm:$0xff]   ;;  %v968_v60 = vld [vmem:[%s1225_s1 + $0x150] sm:$0xff]   ;;  %v972_v0 = vld [vmem:[%s1225_s1 + $0x148] sm:$0xff]  }
  0x14   :  { %837 = vmatpush3.bf16.msra.mxu0 %v934_v18  ;;  %v967_v59 = vld [vmem:[%s1225_s1 + $0x198] sm:$0xff]   ;;  %v969_v61 = vld [vmem:[%s1225_s1 + $0x1d0] sm:$0xff]   ;;  %v973_v1 = vld [vmem:[%s1225_s1 + $0x1c8] sm:$0xff]  }
  0x15   :  { %859 = vmatpush3.bf16.msra.mxu1 %v935_v19  ;;  %838 = vmatprep.subr.bf16.mxu0 %v936_v20  ;;  %v970_v62 = vld [vmem:[%s1225_s1 + $0x110] sm:$0xff]   ;;  %v974_v2 = vld [vmem:[%s1225_s1 + $0x108] sm:$0xff]   ;;  %v976_v4 = vld [vmem:[%s1225_s1 + $0x140] sm:$0xff]  }
  0x16   :  { %860 = vmatprep.subr.bf16.mxu1 %v937_v21  ;;  %v971_v63 = vld [vmem:[%s1225_s1 + $0x190] sm:$0xff]   ;;  %v975_v3 = vld [vmem:[%s1225_s1 + $0x188] sm:$0xff]   ;;  %v977_v5 = vld [vmem:[%s1225_s1 + $0x1c0] sm:$0xff]  }
  0x17   :  { %v978_v6 = vld [vmem:[%s1225_s1 + $0x100] sm:$0xff]   ;;  %v14_v8 = vld [vmem:[%s1226_s0 + $0x10] sm:$0xff]  ;;  %v15_v12 = vld [vmem:[%s1226_s0 + $0x18] sm:$0xff] }
  0x18   :  { %839 = vmatpush3.bf16.msra.mxu0 %v938_v22  ;;  %v979_v7 = vld [vmem:[%s1225_s1 + $0x180] sm:$0xff]   ;;  %v18_v9 = vld [vmem:[%s1226_s0 + $0x30] sm:$0xff]  ;;  %v19_v13 = vld [vmem:[%s1226_s0 + $0x38] sm:$0xff] }
  0x19   :  { %861 = vmatpush3.bf16.msra.mxu1 %v939_v23  ;;  %840 = vmatprep.subr.bf16.mxu0 %v940_v24  ;;  %v760_v10 = vcombine.low %v14_v8, %v18_v9  ;;  %v761_v11 = vcombine.high %v14_v8, %v18_v9  ;;  %v762_v14 = vcombine.low %v15_v12, %v19_v13 }
  0x1a   :  { %862 = vmatprep.subr.bf16.mxu1 %v941_v25  ;;  %v763_v15 = vcombine.high %v15_v12, %v19_v13 }
  0x1c   :  { %841 = vmatpush3.bf16.msra.mxu0 %v942_v26 }
  0x1d   :  { %863 = vmatpush3.bf16.msra.mxu1 %v943_v27  ;;  %842 = vmatprep.subr.bf16.mxu0 %v944_v28 }
  0x1e   :  { %864 = vmatprep.subr.bf16.mxu1 %v945_v29 }
  0x20   :  { %843 = vmatpush3.bf16.msra.mxu0 %v946_v30 }
  0x21   :  { %865 = vmatpush3.bf16.msra.mxu1 %v947_v31  ;;  %872 = vmatprep.subr.bf16.mxu0 %v948_v40 }
  0x22   :  { %894 = vmatprep.subr.bf16.mxu1 %v949_v41 }
  0x23   :  { %605 = vmatmul.mubr.bf16.vlgmr.msra.gmra.mxu0 %v756_v35 }
  0x24   :  { %646 = vmatmul.mubr.bf16.vlgmr.msra.gmra.mxu1 %v758_v38  ;;  %873 = vmatpush3.bf16.msra.mxu0 %v950_v42 }
  0x25   :  { %895 = vmatpush3.bf16.msra.mxu1 %v951_v43  ;;  %874 = vmatprep.subr.bf16.mxu0 %v952_v44 }
  0x26   :  { %896 = vmatprep.subr.bf16.mxu1 %v953_v45  ;;  %686 = vmatprep.mubr.bf16.mxu0 %v761_v11 }
  0x27   :  { %727 = vmatprep.mubr.bf16.mxu1 %v763_v15 }
  0x28   :  { %875 = vmatpush3.bf16.msra.mxu0 %v954_v46 }
  0x29   :  { %897 = vmatpush3.bf16.msra.mxu1 %v955_v47  ;;  %876 = vmatprep.subr.bf16.mxu0 %v956_v48 }
  0x2a   :  { %898 = vmatprep.subr.bf16.mxu1 %v957_v49 }
  0x2c   :  { %877 = vmatpush3.bf16.msra.mxu0 %v958_v50 }
  0x2d   :  { %899 = vmatpush3.bf16.msra.mxu1 %v959_v51  ;;  %878 = vmatprep.subr.bf16.mxu0 %v960_v52 }
  0x2e   :  { %900 = vmatprep.subr.bf16.mxu1 %v961_v53 }
  0x30   :  { %879 = vmatpush3.bf16.msra.mxu0 %v962_v54 }
  0x31   :  { %901 = vmatpush3.bf16.msra.mxu1 %v963_v55  ;;  %880 = vmatprep.subr.bf16.mxu0 %v964_v56 }
  0x32   :  { %902 = vmatprep.subr.bf16.mxu1 %v965_v57 }
  0x34   :  { %881 = vmatpush3.bf16.msra.mxu0 %v966_v58 }
  0x35   :  { %903 = vmatpush3.bf16.msra.mxu1 %v967_v59  ;;  %882 = vmatprep.subr.bf16.mxu0 %v968_v60 }
  0x36   :  { %904 = vmatprep.subr.bf16.mxu1 %v969_v61 }
  0x38   :  { %883 = vmatpush3.bf16.msra.mxu0 %v970_v62 }
  0x39   :  { %905 = vmatpush3.bf16.msra.mxu1 %v971_v63  ;;  %884 = vmatprep.subr.bf16.mxu0 %v972_v0 }
  0x3a   :  { %906 = vmatprep.subr.bf16.mxu1 %v973_v1 }
  0x3c   :  { %885 = vmatpush3.bf16.msra.mxu0 %v974_v2 }
  0x3d   :  { %907 = vmatpush3.bf16.msra.mxu1 %v975_v3  ;;  %886 = vmatprep.subr.bf16.mxu0 %v976_v4 }
  0x3e   :  { %908 = vmatprep.subr.bf16.mxu1 %v977_v5 }
  0x40   :  { %887 = vmatpush3.bf16.msra.mxu0 %v978_v6 }
  0x41   :  { %909 = vmatpush3.bf16.msra.mxu1 %v979_v7 }
  0x43   :  { %687 = vmatmul.mubr.bf16.vlgmr.msra.gmra.mxu0 %v760_v10 }
  0x44   :  { %728 = vmatmul.mubr.bf16.vlgmr.msra.gmra.mxu1 %v762_v14 }
  0xe3   :  { %v844_v16 = vpop.f32.mrf.mxu0 }
  0xe4   :  { %v866_v17 = vpop.f32.mrf.mxu1 }
  0xe5   :  { %v845_v18 = vpop.f32.mrf.mxu0 }
  0xe6   :  { %v867_v19 = vpop.f32.mrf.mxu1  ;;  %v846_v23 = vadd.f32 %v845_v18, %v844_v16 }
  0xe7   :  { %v847_v20 = vpop.f32.mrf.mxu0  ;;  %v868_v24 = vadd.f32 %v867_v19, %v866_v17 }
  0xe8   :  { %v869_v21 = vpop.f32.mrf.mxu1 }
  0xe9   :  { %v848_v22 = vpop.f32.mrf.mxu0  ;;  %v648_v29 = vadd.f32 %v868_v24, %v846_v23 }
  0xea   :  { %v870_v25 = vpop.f32.mrf.mxu1  ;;  %v849_v30 = vadd.f32 %v848_v22, %v847_v20 }
  0xeb   :  { %v871_v31 = vadd.f32 %v870_v25, %v869_v21 }
  0xed   :  { %v651_v39 = vadd.f32 %v871_v31, %v849_v30 }
 0x103   :  { %v888_v26 = vpop.f32.mrf.mxu0 }
 0x104   :  { %v910_v27 = vpop.f32.mrf.mxu1 }
 0x105   :  { %v889_v28 = vpop.f32.mrf.mxu0 }
 0x106   :  { %v890_v32 = vadd.f32 %v889_v28, %v888_v26  ;;  %v911_v33 = vpop.f32.mrf.mxu1 }
 0x107   :  { %v891_v34 = vpop.f32.mrf.mxu0  ;;  %v912_v36 = vadd.f32 %v911_v33, %v910_v27 }
 0x108   :  { %v689_v35 = vadd.f32 %v890_v32, %v648_v29  ;;  %v913_v37 = vpop.f32.mrf.mxu1 }
 0x109   :  { %v892_v38 = vpop.f32.mrf.mxu0 }
 0x10a   :  { %v730_v40 = vadd.f32 %v912_v36, %v689_v35  ;;  %v893_v41 = vadd.f32 %v892_v38, %v891_v34  ;;  %v914_v42 = vpop.f32.mrf.mxu1 }
 0x10b   :  { %v915_v45 = vadd.f32 %v914_v42, %v913_v37 }
 0x10c   :  { %v736_v43 = vsub.f32 0.0, %v730_v40  ;;  %v692_v44 = vadd.f32 %v893_v41, %v651_v39 }
 0x10e   :  { %v738_v46 = vmul.f32 1.442695, %v736_v43  ;;  %v733_v47 = vadd.f32 %v915_v45, %v692_v44 }
 0x110   :  { %980 = vpow2.f32 %v738_v46  ;;  %v737_v48 = vsub.f32 0.0, %v733_v47 }
 0x112   :  { %v740_v49 = vmul.f32 1.442695, %v737_v48 }
 0x114   :  { %982 = vpow2.f32 %v740_v49 }
 0x11d   :  { %v981_v50 = vpop.eup %980 }
 0x11e   :  { %v742_v51 = vadd.f32 1.0, %v981_v50 }
 0x120   :  { %984 = vrcp.f32 %v742_v51 }
 0x121   :  { %v983_v52 = vpop.eup %982 }
 0x122   :  { %v743_v53 = vadd.f32 1.0, %v983_v52 }
 0x124   :  { %986 = vrcp.f32 %v743_v53 }
 0x12d   :  { %v985_v54 = vpop.eup %984 }
 0x12e   :  { %v746_v55 = vmax.f32 %v985_v54, 0.0 }
 0x130   :  { %v748_v56 = vmin.f32 %v746_v55, 1.0 }
 0x131   :  { %v987_v57 = vpop.eup %986 }
 0x132   :  { %750 = vst [vmem:[%s1227_s2] sm:$0xff] %v748_v56  ;;  %v747_v58 = vmax.f32 %v987_v57, 0.0 }
 0x134   :  { %v749_v59 = vmin.f32 %v747_v58, 1.0 }
 0x136   :  { %751 = vst [vmem:[%s1227_s2 + $0x8] sm:$0xff] %v749_v59 }

</bundles_post_ra>
